<compile_context>
chip_gen: v7x
topology: tpu7x:2x2x1
jax: 0.10.0
libtpu: 0.0.40
codegen_flags: <defaults>
</compile_context>

<pallas_src>
import functools

import jax
import jax.numpy as jnp
from jax.experimental import pallas as pl
from jax.experimental.pallas import tpu as pltpu


def _round_up(x, m):
    return (x + m - 1) // m * m


def _lane(c):
    return _round_up(c, 128)


def _detect_vmem_bytes():
    try:
        info = pltpu.get_tpu_info()
        cap = getattr(info, "vmem_capacity_bytes", None)
        if cap:
            return int(cap)
    except Exception:
        pass
    return 64 * 1024 * 1024            # conservative fallback (v7x-sized VMEM)


_VMEM_BYTES = _detect_vmem_bytes()
VMEM_LIMIT = min(int(_VMEM_BYTES * 0.72), 100 * 1024 * 1024)
_CONV_VMEM_BUDGET = min(int(_VMEM_BYTES * 0.40), 52 * 1024 * 1024)


# ---------------------------------------------------------------------------
# Conv3x3(pad=1) + folded BatchNorm/bias + ReLU (+ optional fused 2x2 maxpool)
# ---------------------------------------------------------------------------
def _conv_bn_relu_kernel(x_ref, w_ref, shift_ref, o_ref,
                         *, th, W, Wr, C, Cout, pool):
    slab = x_ref[0, 0]                                     # (th+2, Wr+2, C) bf16
    # Build the 3 kw-shifted views once (2 sublane relayouts per step instead of 6
    # misaligned per-tap slices) and flatten so every per-kh window below is an
    # aligned multiple-of-8 row slice (Wr % 8 == 0).
    taps = [slab[:, kw:kw + Wr, :].reshape((th + 2) * Wr, C) for kw in range(3)]
    acc = None
    for kh in range(3):
        lo = kh * Wr
        for kw in range(3):
            xs = taps[kw][lo:lo + th * Wr]                 # aligned leading-dim window
            d = jnp.dot(xs, w_ref[kh, kw], preferred_element_type=jnp.float32)
            acc = d if acc is None else acc + d
    y = jnp.maximum(acc + shift_ref[...], 0.0)             # folded conv-bias/BN + ReLU
    y = y.reshape(th, Wr, Cout)[:, :W, :]
    if pool:                                               # fused MaxPool2d(2, stride=2)
        y = y.reshape(th // 2, 2, W, Cout)
        y = jnp.maximum(y[:, 0], y[:, 1])
        y = y.reshape(th // 2, W // 2, 2, Cout)
        y = jnp.maximum(y[:, :, 0, :], y[:, :, 1, :])
    o_ref[0] = y.astype(o_ref.dtype)


def _conv_vmem_est(th, Wr, C, Cout, pool):
    cl, col = _lane(C), _lane(Cout)
    slab = (th + 2) * (Wr + 2) * cl * 2
    taps = 3 * (th + 2) * Wr * cl * 2
    acc = th * Wr * col * 4
    oh = th // 2 if pool else th
    ow = Wr // 2 if pool else Wr
    out = oh * ow * col * 2
    wts = 9 * max(C, 8) * col * 2
    return 2 * slab + taps + 2 * acc + 2 * out + 2 * wts


def _pick_conv_th(H, W, C, Cout, pool):
    Wr = _round_up(W, 8)
    divs = [d for d in range(2, H + 1, 2) if H % d == 0]          # even divisors of H
    pref = set(d for d in divs if 8 <= d <= H // 2)               # >=2 row blocks (megacore)
    cands = sorted(divs, key=lambda d: (d in pref, d), reverse=True)
    for th in cands:
        if _conv_vmem_est(th, Wr, C, Cout, pool) <= _CONV_VMEM_BUDGET:
            return th
    return cands[-1]


def conv3x3_bn_relu(x, w4, shift, *, pool):
    """x: (N,H,W,C) bf16 NHWC.  w4: (3,3,C,Cout) bf16 (BN scale folded).  shift: (Cout,) f32."""
    N, H, W, C = x.shape
    Cout = w4.shape[-1]
    Wr = _round_up(W, 8)
    th = _pick_conv_th(H, W, C, Cout, pool)
    nb = H // th
    # Zero-pad H/W by 1 (plus the W alignment tail), then gather overlapping (th+2)-row
    # halo slabs so the kernel never rebuilds the slab in VMEM.
    xp = jnp.pad(x, ((0, 0), (1, 1), (1, 1 + Wr - W), (0, 0)))
    rows = jnp.arange(nb)[:, None] * th + jnp.arange(th + 2)[None, :]
    slabs = jnp.take(xp, rows, axis=1)                    # (N, nb, th+2, Wr+2, C)

    Ho, Wo = (H // 2, W // 2) if pool else (H, W)
    tho = th // 2 if pool else th
    kern = functools.partial(_conv_bn_relu_kernel, th=th, W=W, Wr=Wr, C=C,
                             Cout=Cout, pool=pool)
    return pl.pallas_call(
        kern,
        out_shape=jax.ShapeDtypeStruct((N, Ho, Wo, Cout), jnp.bfloat16),
        grid=(N, nb),
        in_specs=[
            pl.BlockSpec((1, 1, th + 2, Wr + 2, C), lambda n, hb: (n, hb, 0, 0, 0)),
            pl.BlockSpec((3, 3, C, Cout), lambda n, hb: (0, 0, 0, 0)),
            pl.BlockSpec((1, Cout), lambda n, hb: (0, 0)),
        ],
        out_specs=pl.BlockSpec((1, tho, Wo, Cout), lambda n, hb: (n, hb, 0, 0)),
        compiler_params=pltpu.CompilerParams(
            dimension_semantics=("parallel", "parallel"),
            vmem_limit_bytes=VMEM_LIMIT),
    )(slabs, w4, shift.reshape(1, Cout))


# ---------------------------------------------------------------------------
# Fused matmul + bias (+ optional ReLU): FC layers and the Cin=3 im2col conv path
# ---------------------------------------------------------------------------
def _matmul_bias_kernel(a_ref, b_ref, bias_ref, o_ref, acc_ref, *, relu):
    @pl.when(pl.program_id(2) == 0)
    def _():
        acc_ref[...] = jnp.zeros_like(acc_ref)

    acc_ref[...] += jnp.dot(a_ref[...], b_ref[...],
                            preferred_element_type=jnp.float32)

    @pl.when(pl.program_id(2) == pl.num_programs(2) - 1)
    def _():
        y = acc_ref[...] + bias_ref[...]
        if relu:
            y = jnp.maximum(y, 0.0)
        o_ref[...] = y.astype(o_ref.dtype)


def _largest_div(n, cap, step):
    d = min(cap, n) // step * step
    while d >= step:
        if n % d == 0:
            return d
        d -= step
    return step


def matmul_bias(a, b, bias, *, relu, out_dtype):
    """out = maybe_relu(a @ b + bias).  a:(M,K)  b:(K,Nout)  bias:(Nout,)."""
    M, K = a.shape
    K2, Nout = b.shape
    assert K == K2
    a = a.astype(jnp.bfloat16)
    b = b.astype(jnp.bfloat16)
    bias = bias.astype(jnp.float32)

    Kp = _round_up(K, 128) if K >= 128 else _round_up(K, 8)
    if Kp != K:
        a = jnp.pad(a, ((0, 0), (0, Kp - K)))
        b = jnp.pad(b, ((0, Kp - K), (0, 0)))
    Mp = _round_up(max(M, 16), 16)
    if Mp != M:
        a = jnp.pad(a, ((0, Mp - M), (0, 0)))
    Np = _round_up(Nout, 128)
    if Np != Nout:
        b = jnp.pad(b, ((0, 0), (0, Np - Nout)))
        bias = jnp.pad(bias, (0, Np - Nout))

    tm = _largest_div(Mp, 2048, 16)
    tk = Kp if Kp < 128 else _largest_div(Kp, 4096, 128)
    if Np % 1024 == 0 and Np > 1024:
        tn = 1024
    elif Np % 512 == 0:
        tn = 512                       # keeps >=2 "parallel" j blocks for the 1024-wide FC3
    elif Np % 256 == 0:
        tn = 256
    else:
        tn = 128

    kern = functools.partial(_matmul_bias_kernel, relu=relu)
    out = pl.pallas_call(
        kern,
        out_shape=jax.ShapeDtypeStruct((Mp, Np), out_dtype),
        grid=(Mp // tm, Np // tn, Kp // tk),
        in_specs=[
            pl.BlockSpec((tm, tk), lambda i, j, k: (i, k)),
            pl.BlockSpec((tk, tn), lambda i, j, k: (k, j)),
            pl.BlockSpec((1, tn), lambda i, j, k: (0, j)),
        ],
        out_specs=pl.BlockSpec((tm, tn), lambda i, j, k: (i, j)),
        scratch_shapes=[pltpu.VMEM((tm, tn), jnp.float32)],
        compiler_params=pltpu.CompilerParams(
            dimension_semantics=("parallel", "parallel", "arbitrary"),
            vmem_limit_bytes=VMEM_LIMIT),
    )(a, b, bias.reshape(1, Np))
    return out[:M, :Nout]


def conv3x3_im2col(x, w4, shift):
    """Cin<=8 path (conv1_1): 3x3 im2col in the wrapper -> one MXU matmul (K=9*Cin)."""
    N, H, W, C = x.shape
    Cout = w4.shape[-1]
    xp = jnp.pad(x, ((0, 0), (1, 1), (1, 1), (0, 0)))
    cols = [xp[:, kh:kh + H, kw:kw + W, :] for kh in range(3) for kw in range(3)]
    a = jnp.concatenate(cols, axis=-1).reshape(N * H * W, 9 * C)
    wf = w4.reshape(9 * C, Cout)
    y = matmul_bias(a, wf, shift, relu=True, out_dtype=jnp.bfloat16)
    return y.reshape(N, H, W, Cout)


# ---------------------------------------------------------------------------
# Softmax(dim=1)
# ---------------------------------------------------------------------------
def _softmax_kernel(x_ref, o_ref):
    x = x_ref[...]
    m = jnp.max(x, axis=1, keepdims=True)
    e = jnp.exp(x - m)
    o_ref[...] = e / jnp.sum(e, axis=1, keepdims=True)


def softmax_rows(x):
    B, D = x.shape
    return pl.pallas_call(
        _softmax_kernel,
        out_shape=jax.ShapeDtypeStruct((B, D), x.dtype),
        grid=(1,),
        in_specs=[pl.BlockSpec((B, D), lambda i: (0, 0))],
        out_specs=pl.BlockSpec((B, D), lambda i: (0, 0)),
        compiler_params=pltpu.CompilerParams(vmem_limit_bytes=VMEM_LIMIT),
    )(x)


# ---------------------------------------------------------------------------
# Parameters (deterministic synthetic; shapes match Vgg16Conv_bn)
# ---------------------------------------------------------------------------
def init_params(key, num_cls=1000):
    conv_cfg = [(3, 64), (64, 64),
                (64, 128), (128, 128),
                (128, 256), (256, 256), (256, 256),
                (256, 512), (512, 512), (512, 512),
                (512, 512), (512, 512), (512, 512)]
    params = {"convs": [], "fcs": []}
    for cin, cout in conv_cfg:
        key, k1, k2, k3, k4, k5, k6 = jax.random.split(key, 7)
        std = (2.0 / (cin * 9)) ** 0.5
        w = jax.random.normal(k1, (cout, cin, 3, 3), jnp.float32) * std
        b = 0.01 * jax.random.normal(k2, (cout,), jnp.float32)
        gamma = 1.0 + 0.1 * jax.random.normal(k3, (cout,), jnp.float32)
        beta = 0.1 * jax.random.normal(k4, (cout,), jnp.float32)
        mean = 0.1 * jax.random.normal(k5, (cout,), jnp.float32)
        var = jax.random.uniform(k6, (cout,), jnp.float32, minval=0.5, maxval=1.5)
        params["convs"].append((w, b, gamma, beta, mean, var))
    fc_cfg = [(512 * 7 * 7, 4096), (4096, 4096), (4096, num_cls)]
    for fin, fout in fc_cfg:
        key, k1, k2 = jax.random.split(key, 3)
        std = (2.0 / fin) ** 0.5
        w = jax.random.normal(k1, (fout, fin), jnp.float32) * std
        b = 0.01 * jax.random.normal(k2, (fout,), jnp.float32)
        params["fcs"].append((w, b))
    return params


def prepare_params(raw, eps=1e-5):
    """Fold eval-mode BN + conv bias: y = relu(conv(x, w*scale) + shift); bf16 weights."""
    convs = []
    for w, b, gamma, beta, mean, var in raw["convs"]:
        scale = gamma / jnp.sqrt(var + eps)
        shift = beta + (b - mean) * scale
        w4 = jnp.transpose(w, (2, 3, 1, 0)) * scale[None, None, None, :]   # (kh,kw,Cin,Cout)
        convs.append((w4.astype(jnp.bfloat16), shift.astype(jnp.float32)))
    fcs = []
    for w, b in raw["fcs"]:
        fcs.append((jnp.transpose(w, (1, 0)).astype(jnp.bfloat16),         # (K, Nout)
                    b.astype(jnp.float32)))
    return {"convs": convs, "fcs": fcs}


# ---------------------------------------------------------------------------
# Forward pass (matches Vgg16Conv_bn.forward; NCHW input like PyTorch)
# ---------------------------------------------------------------------------
def vgg16_bn_forward(params, x):
    x = jnp.transpose(x, (0, 2, 3, 1)).astype(jnp.bfloat16)     # NHWC bf16 conv stack
    ci = 0
    for nconv in (2, 2, 3, 3, 3):                               # VGG16 blocks
        for li in range(nconv):
            w4, shift = params["convs"][ci]
            ci += 1
            pool = li == nconv - 1          # maxpool fused into the block's last conv
            if w4.shape[2] <= 8:            # Cin=3 first layer (never the pooled one)
                x = conv3x3_im2col(x, w4, shift)
            else:
                x = conv3x3_bn_relu(x, w4, shift, pool=pool)

    N = x.shape[0]
    feat = jnp.transpose(x, (0, 3, 1, 2)).reshape(N, -1)        # NCHW flatten order

    (w1, b1), (w2, b2), (w3, b3) = params["fcs"]
    h = matmul_bias(feat, w1, b1, relu=True, out_dtype=jnp.bfloat16)
    # TODO(synk): nn.Dropout() treated as identity (inference-mode semantics).
    h = matmul_bias(h, w2, b2, relu=True, out_dtype=jnp.bfloat16)
    logits = matmul_bias(h, w3, b3, relu=False, out_dtype=jnp.float32)
    return softmax_rows(logits)                                 # nn.Softmax(dim=1)


# ---------------------------------------------------------------------------
# Reference (XLA) for a quick in-script self-check of the fused conv kernel
# ---------------------------------------------------------------------------
def _ref_conv_block(x, w4, shift, pool):
    y = jax.lax.conv_general_dilated(
        x.astype(jnp.float32), w4.astype(jnp.float32), (1, 1), "SAME",
        dimension_numbers=("NHWC", "HWIO", "NHWC"))
    y = jnp.maximum(y + shift.reshape(1, 1, 1, -1), 0.0)
    if pool:
        y = jax.lax.reduce_window(y, -jnp.inf, jax.lax.max,
                                  (1, 2, 2, 1), (1, 2, 2, 1), "VALID")
    return y


if __name__ == "__main__":
    # Small self-check of the fused conv+BN+ReLU+pool kernel against XLA.
    kt = jax.random.split(jax.random.PRNGKey(1), 3)
    xt = jax.random.normal(kt[0], (1, 16, 16, 128), jnp.bfloat16)
    wt = (0.05 * jax.random.normal(kt[1], (3, 3, 128, 128), jnp.float32)).astype(jnp.bfloat16)
    st = 0.1 * jax.random.normal(kt[2], (128,), jnp.float32)
    got = jax.block_until_ready(conv3x3_bn_relu(xt, wt, st, pool=True)).astype(jnp.float32)
    ref = _ref_conv_block(xt, wt, st, True)
    assert bool(jnp.allclose(got, ref, atol=3e-2, rtol=3e-2)), \
        float(jnp.max(jnp.abs(got - ref)))

    key = jax.random.PRNGKey(0)
    kp, kx = jax.random.split(key)
    num_cls = 1000
    raw = init_params(kp, num_cls=num_cls)
    params = jax.tree_util.tree_map(jax.block_until_ready, prepare_params(raw))
    del raw

    # classifier hardcodes 512*7*7 features -> forward implies 224x224 inputs;
    # batch=1 keeps the run small.
    x = jax.random.normal(kx, (1, 3, 224, 224), jnp.float32)

    fwd = jax.jit(vgg16_bn_forward)
    out = jax.block_until_ready(fwd(params, x))

    assert out.shape == (1, num_cls), out.shape
    assert bool(jnp.all(jnp.isfinite(out)))
    assert bool(jnp.allclose(jnp.sum(out, axis=1), 1.0, atol=1e-3))
    print("KERNEL_OK")
</pallas_src>

<mosaic_0001>
module attributes {stable_mosaic.version = 11 : i64} {
  func.func @_conv_bn_relu_kernel(%arg0: i32, %arg1: i32, %arg2: memref<1x1x10x18x128xbf16, #tpu.memory_space<vmem>>, %arg3: memref<3x3x128x128xbf16, #tpu.memory_space<vmem>>, %arg4: memref<1x128xf32, #tpu.memory_space<vmem>>, %arg5: memref<1x4x8x128xbf16, #tpu.memory_space<vmem>>) attributes {dimension_semantics = [#tpu.dimension_semantics<parallel>, #tpu.dimension_semantics<parallel>], iteration_bounds = array<i64: 1, 2>, scalar_prefetch = 0 : i64, scratch_operands = 0 : i64, tpu.core_type = #tpu.core_type<tc>, window_params = [{transform_indices = @transform_0, window_bounds = array<i64: 1, 1, 10, 18, 128>}, {pipeline_mode = #tpu.pipeline_mode<synchronous>, transform_indices = @transform_1, window_bounds = array<i64: 3, 3, 128, 128>}, {pipeline_mode = #tpu.pipeline_mode<synchronous>, transform_indices = @transform_2, window_bounds = array<i64: 1, 128>}, {transform_indices = @transform_3, window_bounds = array<i64: 1, 4, 8, 128>}]} {
    %c0 = arith.constant 0 : index
    %c0_0 = arith.constant 0 : index
    %c0_1 = arith.constant 0 : index
    %c0_2 = arith.constant 0 : index
    %c0_3 = arith.constant 0 : index
    %0 = vector.load %arg2[%c0, %c0_0, %c0_1, %c0_2, %c0_3] : memref<1x1x10x18x128xbf16, #tpu.memory_space<vmem>>, vector<1x1x10x18x128xbf16>
    %1 = vector.shape_cast %0 : vector<1x1x10x18x128xbf16> to vector<10x18x128xbf16>
    %2 = vector.extract_strided_slice %1 {offsets = [0, 0, 0], sizes = [10, 16, 128], strides = [1, 1, 1]} : vector<10x18x128xbf16> to vector<10x16x128xbf16>
    %3 = vector.shape_cast %2 : vector<10x16x128xbf16> to vector<160x128xbf16>
    %4 = vector.extract_strided_slice %1 {offsets = [0, 1, 0], sizes = [10, 16, 128], strides = [1, 1, 1]} : vector<10x18x128xbf16> to vector<10x16x128xbf16>
    %5 = vector.shape_cast %4 : vector<10x16x128xbf16> to vector<160x128xbf16>
    %6 = vector.extract_strided_slice %1 {offsets = [0, 2, 0], sizes = [10, 16, 128], strides = [1, 1, 1]} : vector<10x18x128xbf16> to vector<10x16x128xbf16>
    %7 = vector.shape_cast %6 : vector<10x16x128xbf16> to vector<160x128xbf16>
    %8 = vector.extract_strided_slice %3 {offsets = [0, 0], sizes = [128, 128], strides = [1, 1]} : vector<160x128xbf16> to vector<128x128xbf16>
    %c0_4 = arith.constant 0 : index
    %c0_5 = arith.constant 0 : index
    %c0_6 = arith.constant 0 : index
    %c0_7 = arith.constant 0 : index
    %9 = vector.load %arg3[%c0_4, %c0_5, %c0_6, %c0_7] : memref<3x3x128x128xbf16, #tpu.memory_space<vmem>>, vector<1x1x128x128xbf16>
    %10 = vector.shape_cast %9 : vector<1x1x128x128xbf16> to vector<128x128xbf16>
    %cst = arith.constant dense<0.000000e+00> : vector<128x128xf32>
    %11 = tpu.matmul %8, %10, %cst {dimension_numbers = #tpu.dot_dimension_numbers<[1], [0], [0], [1], [0, 0, 1, 1], [], []>} : vector<128x128xbf16>, vector<128x128xbf16>, vector<128x128xf32> -> vector<128x128xf32>
    %12 = vector.extract_strided_slice %5 {offsets = [0, 0], sizes = [128, 128], strides = [1, 1]} : vector<160x128xbf16> to vector<128x128xbf16>
    %c0_8 = arith.constant 0 : index
    %c1 = arith.constant 1 : index
    %c0_9 = arith.constant 0 : index
    %c0_10 = arith.constant 0 : index
    %13 = vector.load %arg3[%c0_8, %c1, %c0_9, %c0_10] : memref<3x3x128x128xbf16, #tpu.memory_space<vmem>>, vector<1x1x128x128xbf16>
    %14 = vector.shape_cast %13 : vector<1x1x128x128xbf16> to vector<128x128xbf16>
    %cst_11 = arith.constant dense<0.000000e+00> : vector<128x128xf32>
    %15 = tpu.matmul %12, %14, %cst_11 {dimension_numbers = #tpu.dot_dimension_numbers<[1], [0], [0], [1], [0, 0, 1, 1], [], []>} : vector<128x128xbf16>, vector<128x128xbf16>, vector<128x128xf32> -> vector<128x128xf32>
    %16 = arith.addf %11, %15 : vector<128x128xf32>
    %17 = vector.extract_strided_slice %7 {offsets = [0, 0], sizes = [128, 128], strides = [1, 1]} : vector<160x128xbf16> to vector<128x128xbf16>
    %c0_12 = arith.constant 0 : index
    %c2 = arith.constant 2 : index
    %c0_13 = arith.constant 0 : index
    %c0_14 = arith.constant 0 : index
    %18 = vector.load %arg3[%c0_12, %c2, %c0_13, %c0_14] : memref<3x3x128x128xbf16, #tpu.memory_space<vmem>>, vector<1x1x128x128xbf16>
    %19 = vector.shape_cast %18 : vector<1x1x128x128xbf16> to vector<128x128xbf16>
    %cst_15 = arith.constant dense<0.000000e+00> : vector<128x128xf32>
    %20 = tpu.matmul %17, %19, %cst_15 {dimension_numbers = #tpu.dot_dimension_numbers<[1], [0], [0], [1], [0, 0, 1, 1], [], []>} : vector<128x128xbf16>, vector<128x128xbf16>, vector<128x128xf32> -> vector<128x128xf32>
    %21 = arith.addf %16, %20 : vector<128x128xf32>
    %22 = vector.extract_strided_slice %3 {offsets = [16, 0], sizes = [128, 128], strides = [1, 1]} : vector<160x128xbf16> to vector<128x128xbf16>
    %c1_16 = arith.constant 1 : index
    %c0_17 = arith.constant 0 : index
    %c0_18 = arith.constant 0 : index
    %c0_19 = arith.constant 0 : index
    %23 = vector.load %arg3[%c1_16, %c0_17, %c0_18, %c0_19] : memref<3x3x128x128xbf16, #tpu.memory_space<vmem>>, vector<1x1x128x128xbf16>
    %24 = vector.shape_cast %23 : vector<1x1x128x128xbf16> to vector<128x128xbf16>
    %cst_20 = arith.constant dense<0.000000e+00> : vector<128x128xf32>
    %25 = tpu.matmul %22, %24, %cst_20 {dimension_numbers = #tpu.dot_dimension_numbers<[1], [0], [0], [1], [0, 0, 1, 1], [], []>} : vector<128x128xbf16>, vector<128x128xbf16>, vector<128x128xf32> -> vector<128x128xf32>
    %26 = arith.addf %21, %25 : vector<128x128xf32>
    %27 = vector.extract_strided_slice %5 {offsets = [16, 0], sizes = [128, 128], strides = [1, 1]} : vector<160x128xbf16> to vector<128x128xbf16>
    %c1_21 = arith.constant 1 : index
    %c1_22 = arith.constant 1 : index
    %c0_23 = arith.constant 0 : index
    %c0_24 = arith.constant 0 : index
    %28 = vector.load %arg3[%c1_21, %c1_22, %c0_23, %c0_24] : memref<3x3x128x128xbf16, #tpu.memory_space<vmem>>, vector<1x1x128x128xbf16>
    %29 = vector.shape_cast %28 : vector<1x1x128x128xbf16> to vector<128x128xbf16>
    %cst_25 = arith.constant dense<0.000000e+00> : vector<128x128xf32>
    %30 = tpu.matmul %27, %29, %cst_25 {dimension_numbers = #tpu.dot_dimension_numbers<[1], [0], [0], [1], [0, 0, 1, 1], [], []>} : vector<128x128xbf16>, vector<128x128xbf16>, vector<128x128xf32> -> vector<128x128xf32>
    %31 = arith.addf %26, %30 : vector<128x128xf32>
    %32 = vector.extract_strided_slice %7 {offsets = [16, 0], sizes = [128, 128], strides = [1, 1]} : vector<160x128xbf16> to vector<128x128xbf16>
    %c1_26 = arith.constant 1 : index
    %c2_27 = arith.constant 2 : index
    %c0_28 = arith.constant 0 : index
    %c0_29 = arith.constant 0 : index
    %33 = vector.load %arg3[%c1_26, %c2_27, %c0_28, %c0_29] : memref<3x3x128x128xbf16, #tpu.memory_space<vmem>>, vector<1x1x128x128xbf16>
    %34 = vector.shape_cast %33 : vector<1x1x128x128xbf16> to vector<128x128xbf16>
    %cst_30 = arith.constant dense<0.000000e+00> : vector<128x128xf32>
    %35 = tpu.matmul %32, %34, %cst_30 {dimension_numbers = #tpu.dot_dimension_numbers<[1], [0], [0], [1], [0, 0, 1, 1], [], []>} : vector<128x128xbf16>, vector<128x128xbf16>, vector<128x128xf32> -> vector<128x128xf32>
    %36 = arith.addf %31, %35 : vector<128x128xf32>
    %37 = vector.extract_strided_slice %3 {offsets = [32, 0], sizes = [128, 128], strides = [1, 1]} : vector<160x128xbf16> to vector<128x128xbf16>
    %c2_31 = arith.constant 2 : index
    %c0_32 = arith.constant 0 : index
    %c0_33 = arith.constant 0 : index
    %c0_34 = arith.constant 0 : index
    %38 = vector.load %arg3[%c2_31, %c0_32, %c0_33, %c0_34] : memref<3x3x128x128xbf16, #tpu.memory_space<vmem>>, vector<1x1x128x128xbf16>
    %39 = vector.shape_cast %38 : vector<1x1x128x128xbf16> to vector<128x128xbf16>
    %cst_35 = arith.constant dense<0.000000e+00> : vector<128x128xf32>
    %40 = tpu.matmul %37, %39, %cst_35 {dimension_numbers = #tpu.dot_dimension_numbers<[1], [0], [0], [1], [0, 0, 1, 1], [], []>} : vector<128x128xbf16>, vector<128x128xbf16>, vector<128x128xf32> -> vector<128x128xf32>
    %41 = arith.addf %36, %40 : vector<128x128xf32>
    %42 = vector.extract_strided_slice %5 {offsets = [32, 0], sizes = [128, 128], strides = [1, 1]} : vector<160x128xbf16> to vector<128x128xbf16>
    %c2_36 = arith.constant 2 : index
    %c1_37 = arith.constant 1 : index
    %c0_38 = arith.constant 0 : index
    %c0_39 = arith.constant 0 : index
    %43 = vector.load %arg3[%c2_36, %c1_37, %c0_38, %c0_39] : memref<3x3x128x128xbf16, #tpu.memory_space<vmem>>, vector<1x1x128x128xbf16>
    %44 = vector.shape_cast %43 : vector<1x1x128x128xbf16> to vector<128x128xbf16>
    %cst_40 = arith.constant dense<0.000000e+00> : vector<128x128xf32>
    %45 = tpu.matmul %42, %44, %cst_40 {dimension_numbers = #tpu.dot_dimension_numbers<[1], [0], [0], [1], [0, 0, 1, 1], [], []>} : vector<128x128xbf16>, vector<128x128xbf16>, vector<128x128xf32> -> vector<128x128xf32>
    %46 = arith.addf %41, %45 : vector<128x128xf32>
    %47 = vector.extract_strided_slice %7 {offsets = [32, 0], sizes = [128, 128], strides = [1, 1]} : vector<160x128xbf16> to vector<128x128xbf16>
    %c2_41 = arith.constant 2 : index
    %c2_42 = arith.constant 2 : index
    %c0_43 = arith.constant 0 : index
    %c0_44 = arith.constant 0 : index
    %48 = vector.load %arg3[%c2_41, %c2_42, %c0_43, %c0_44] : memref<3x3x128x128xbf16, #tpu.memory_space<vmem>>, vector<1x1x128x128xbf16>
    %49 = vector.shape_cast %48 : vector<1x1x128x128xbf16> to vector<128x128xbf16>
    %cst_45 = arith.constant dense<0.000000e+00> : vector<128x128xf32>
    %50 = tpu.matmul %47, %49, %cst_45 {dimension_numbers = #tpu.dot_dimension_numbers<[1], [0], [0], [1], [0, 0, 1, 1], [], []>} : vector<128x128xbf16>, vector<128x128xbf16>, vector<128x128xf32> -> vector<128x128xf32>
    %51 = arith.addf %46, %50 : vector<128x128xf32>
    %c0_46 = arith.constant 0 : index
    %c0_47 = arith.constant 0 : index
    %52 = vector.load %arg4[%c0_46, %c0_47] : memref<1x128xf32, #tpu.memory_space<vmem>>, vector<1x128xf32>
    %53 = vector.broadcast %52 : vector<1x128xf32> to vector<128x128xf32>
    %54 = arith.addf %51, %53 : vector<128x128xf32>
    %cst_48 = arith.constant 0.000000e+00 : f32
    %55 = vector.broadcast %cst_48 : f32 to vector<128x128xf32>
    %56 = arith.maximumf %54, %55 : vector<128x128xf32>
    %57 = vector.shape_cast %56 : vector<128x128xf32> to vector<8x16x128xf32>
    %58 = vector.shape_cast %57 : vector<8x16x128xf32> to vector<4x2x16x128xf32>
    %59 = vector.extract_strided_slice %58 {offsets = [0, 0, 0, 0], sizes = [4, 1, 16, 128], strides = [1, 1, 1, 1]} : vector<4x2x16x128xf32> to vector<4x1x16x128xf32>
    %60 = vector.shape_cast %59 : vector<4x1x16x128xf32> to vector<4x16x128xf32>
    %61 = vector.extract_strided_slice %58 {offsets = [0, 1, 0, 0], sizes = [4, 1, 16, 128], strides = [1, 1, 1, 1]} : vector<4x2x16x128xf32> to vector<4x1x16x128xf32>
    %62 = vector.shape_cast %61 : vector<4x1x16x128xf32> to vector<4x16x128xf32>
    %63 = arith.maximumf %60, %62 : vector<4x16x128xf32>
    %64 = vector.shape_cast %63 : vector<4x16x128xf32> to vector<4x8x2x128xf32>
    %65 = vector.extract_strided_slice %64 {offsets = [0, 0, 0, 0], sizes = [4, 8, 1, 128], strides = [1, 1, 1, 1]} : vector<4x8x2x128xf32> to vector<4x8x1x128xf32>
    %66 = vector.shape_cast %65 : vector<4x8x1x128xf32> to vector<4x8x128xf32>
    %67 = vector.extract_strided_slice %64 {offsets = [0, 0, 1, 0], sizes = [4, 8, 1, 128], strides = [1, 1, 1, 1]} : vector<4x8x2x128xf32> to vector<4x8x1x128xf32>
    %68 = vector.shape_cast %67 : vector<4x8x1x128xf32> to vector<4x8x128xf32>
    %69 = arith.maximumf %66, %68 : vector<4x8x128xf32>
    %70 = arith.truncf %69 : vector<4x8x128xf32> to vector<4x8x128xbf16>
    %c0_49 = arith.constant 0 : index
    %c0_50 = arith.constant 0 : index
    %c0_51 = arith.constant 0 : index
    %c0_52 = arith.constant 0 : index
    %71 = vector.load %arg5[%c0_49, %c0_50, %c0_51, %c0_52] : memref<1x4x8x128xbf16, #tpu.memory_space<vmem>>, vector<1x4x8x128xbf16>
    %72 = vector.shape_cast %71 : vector<1x4x8x128xbf16> to vector<4x8x128xbf16>
    %73 = vector.shape_cast %70 : vector<4x8x128xbf16> to vector<1x4x8x128xbf16>
    tpu.vector_store %arg5[%c0_49, %c0_50, %c0_51, %c0_52], %73 {strides = array<i32>} : memref<1x4x8x128xbf16, #tpu.memory_space<vmem>>, vector<1x4x8x128xbf16>,
    return
  }
  func.func @transform_0(%arg0: i32, %arg1: i32) -> (i32, i32, i32, i32, i32) {
    %c0_i32 = arith.constant 0 : i32
    %c0_i32_0 = arith.constant 0 : i32
    %c0_i32_1 = arith.constant 0 : i32
    %c0_i32_2 = arith.constant 0 : i32
    return %arg0, %arg1, %c0_i32, %c0_i32_0, %c0_i32_1 : i32, i32, i32, i32, i32
  }
  func.func @transform_1(%arg0: i32, %arg1: i32) -> (i32, i32, i32, i32) {
    %c0_i32 = arith.constant 0 : i32
    %c0_i32_0 = arith.constant 0 : i32
    %c0_i32_1 = arith.constant 0 : i32
    %c0_i32_2 = arith.constant 0 : i32
    %c0_i32_3 = arith.constant 0 : i32
    return %c0_i32, %c0_i32_0, %c0_i32_1, %c0_i32_2 : i32, i32, i32, i32
  }
  func.func @transform_2(%arg0: i32, %arg1: i32) -> (i32, i32) {
    %c0_i32 = arith.constant 0 : i32
    %c0_i32_0 = arith.constant 0 : i32
    %c0_i32_1 = arith.constant 0 : i32
    return %c0_i32, %c0_i32_0 : i32, i32
  }
  func.func @transform_3(%arg0: i32, %arg1: i32) -> (i32, i32, i32, i32) {
    %c0_i32 = arith.constant 0 : i32
    %c0_i32_0 = arith.constant 0 : i32
    %c0_i32_1 = arith.constant 0 : i32
    return %arg0, %arg1, %c0_i32, %c0_i32_0 : i32, i32, i32, i32
  }
}

</mosaic_0001>

<bundles_post_ra>
// kernel: tpu_custom_call.1
= control target key start
LH: loop header
LB: loop body
LE: loop exit
PB: predicated region body
PF: predicated region fallthrough
CT: control target
= control target key end

     0   :  { %8 = vsyncpa [#allocation3], 0  ;;  %s4751_s0 = inlined_call_operand.vmem [shape: bf16[1,2,10,18,128], index: 0, kind: input, shape index: {}]   ;;  %s4752_s1 = inlined_call_operand.hbm [shape: bf16[3,3,128,128], index: 1, kind: input, shape index: {}]   ;;  %s4753_s2 = inlined_call_operand.vmem [shape: f32[1,128], index: 2, kind: input, shape index: {}]   ;;  %s4754_s3 = inlined_call_operand.hbm [shape: bf16[1,8,8,128], index: 3, kind: output, shape index: {}]  }
   0x1   :  { %9 = vsyncpa [#allocation4], 0 }
   0x2   :  { %11 = vsyncpa [#allocation4 + $0x1], 0  ;;  %s4068_s12 = smov 0   ;;  %s4070_s13 = smov 0  }
   0x3   :  { %s4072_s14 = smov 0   ;;  %s4074_s15 = smov 0  }
   0x4   :  { %s4076_s16 = smov 0   ;;  %s4078_s17 = smov 0  }
   0x5 LB: > { %s2975_s18 = sadd.s32 4294967295, %s4039_s17   ;;  %s2976_s19 = sadd.s32 4294967294, %s4039_s17   ;;  %s4039_s17 = sphi %s4078_s17, %s17_s17   ;;  %s4035_s16 = sphi %s4076_s16, %s4776_s16   ;;  %s4031_s15 = sphi %s4074_s15, %s4775_s15   ;;  %s4027_s14 = sphi %s4072_s14, %s4774_s14   ;;  %s4023_s13 = sphi %s4070_s13, %s4773_s13   ;;  %s4019_s12 = sphi %s4068_s12, %s4772_s12  }
   0x6   : > { %s26_s20 = sadd.s32 1, %s4035_s16  ;;  %s108_s21 = sadd.s32 1, %s4027_s14 }
   0x7   : > { %p27_p0 = scmp.ge.s32.totalorder %s26_s20, 2  ;;  %p118_p1 = scmp.ne.s32.totalorder %s4027_s14, %s4023_s13 }
   0x8   : > { %p119_p2 = scmp.eq.s32.totalorder %s2975_s18, 1  ;;  %p124_p3 = scmp.ne.s32.totalorder %s4023_s13, %s4019_s12 }
   0x9   : > { %s4778_s20 = smov (%p27_p0, %s26_s20), 0  ;;  %p125_p5 = scmp.eq.s32.totalorder %s2976_s19, 1 }
   0xa   : > { %p4108_p4 = por %p119_p2, %p118_p1  ;;  %s104_s23 = ssub.s32 %s4035_s16, %s4778_s20 }
   0xb   : > { %p2977_p6 = scmp.ge.s32.totalorder %s4039_s17, 1  ;;  %p106_p7 = scmp.eq.s32.totalorder %s104_s23, 0 }
   0xc   : > { %s4759_s22 = scalar_select %p4108_p4, 1, 0 }
   0xd   : > { %p4115_p8 = por %p125_p5, %p124_p3  ;;  %p132_p9 = scmp.lt.s32.totalorder %s4039_s17, 3 }
   0xe   : > { %s4121_s25 = scalar_select %p106_p7, %s4027_s14, %s108_s21  }
   0xf   : > { %s4760_s24 = scalar_select %p4115_p8, 1, 0 }
  0x10   : > { %p4123_p10 = pnand %p2977_p6, %p132_p9  ;;  %p4127_p11 = scmp.eq.s32.totalorder %s2975_s18, 0 }
  0x11   : > { %s4041_s28 = smov [#allocation2]   ;;  %s3929_s6 = scalar_lea.hbm %s4752_s1, 9216 }
  0x12   : > { %s4761_s26 = scalar_select %p4123_p10, 1, 0 }
  0x13   : > { %s4762_s27 = scalar_select %p4127_p11, 1, 0 }
  0x14   : > { %p3782_p12 = pneg %p4123_p10  ;;  %s144_s29 = sshll.u32 %s4041_s28, 4  ;;  %s145_s29 = int_to_ptr.vmem [resolvable:$true] %s144_s29 }
  0x15   : > { %p3930_p0 = scmp.ne.s32.totalorder %s4752_s1, %s3929_s6  ;;  %p3936_p5 = scmp.lt.u32.totalorder %s3929_s6, %s4752_s1 }
  0x16   : > { %p4135_p13 = pnand %p4127_p11, %p3782_p12 }
  0x18   : > { %p3931_p1 = pneg %p4135_p13 }
  0x1a   : > { %p3932_p2 = pnand %p3931_p1, %p3930_p0 }
  0x1c   : > { %p3933_p3 = pneg %p3932_p2 }
  0x1e   : > { %p3938_p6 = pnand %p3936_p5, %p3933_p3 }
  0x20   : > { %3941 = shalt.err (!%p3938_p6)
}
  0x21   : > { %s3942_s11 = scalar_lea.vmem %s145_s29, 9216  ;;  %p3950_p8 = scmp.lt.s32.totalorder %s145_s29, %s145_s29 }
  0x22   : > { %p3943_p7 = scmp.ne.s32.totalorder %s145_s29, %s3942_s11  ;;  %p3951_p4 = scmp.lt.s32.totalorder %s3942_s11, %s3942_s11 }
  0x24   : > { %p3945_p9 = pnand %p3943_p7, %p3931_p1  ;;  %p3952_p11 = por %p3951_p4, %p3950_p8 }
  0x26   : > { %p3946_p12 = pneg %p3945_p9 }
  0x28   : > { %p3953_p10 = pnand %p3952_p11, %p3946_p12 }
  0x2a   : > { %3956 = shalt.err (!%p3953_p10)
}
  0x2b   : > { %s4042_s18 = smov 64   ;;  %s4043_s19 = smov 4  }
  0x2c   : > { %3785 = dma.hbm_to_vmem [thread:$0]  (!%p4135_p13), %s4752_s1, 9216, %s145_s29, [#allocation3], %s4042_s18, %s4042_s18, %s4043_s19  }
  0x2d   : > { %p4764_p0 = scmp.ne.s32.totalorder %s4761_s26, 0 }
  0x2e   : > { %p4765_p2 = scmp.ne.s32.totalorder (!%p4764_p0), %s4762_s27, 0 }
  0x2f   : > { %175 = sbr.rel (%p4764_p0) target bundleno = 524 (0x20c), region = 32 }
  0x36   : > { %4010 = dma.done.wait (%p4765_p2), [#allocation3], 9216  }
  0x37   : > { %4012 = vsyncadd (%p4765_p2), [#allocation3], 4294958080  ;;  %v3847_v0 = vld [vmem:[#allocation2 + $0x40] sm:$0xff]   ;;  %p205_p4 = scmp.lt.s32.totalorder %s4031_s15, 1  ;;  %v3849_v2 = vld [vmem:[#allocation2 + $0x48] sm:$0xff]   ;;  %vm517_vm3 = vcmask 1042432  }
  0x38   : > { %v3848_v1 = vld [vmem:[#allocation2 + $0x100] sm:$0xff]   ;;  %3343 = vmatprep.subr.bf16.mxu1 %v3847_v0  ;;  %v3850_v3 = vld [vmem:[#allocation2 + $0x108] sm:$0xff]   ;;  %v3851_v4 = vld [vmem:[#allocation2 + $0x50] sm:$0xff]   ;;  %vm244_vm0 = vsmask.f32 3328  ;;  %vm518_vm4 = vcmask 1046532  }
  0x39   : > { %3471 = vmatprep.subr.bf16.mxu0 %v3848_v1  ;;  %3344 = vmatpush3.bf16.msra.mxu1 %v3847_v0  ;;  %v3852_v5 = vld [vmem:[#allocation2 + $0x110] sm:$0xff]   ;;  %s206_s26 = scalar_select %p205_p4, %s4031_s15, 1  ;;  %v3853_v6 = vld [vmem:[#allocation2 + $0x58] sm:$0xff]   ;;  %vm245_vm1 = vsmask.f32 7440  ;;  %v3855_v8 = vld [vmem:[#allocation2 + $0x60] sm:$0xff]  }
  0x3a   : > { %3472 = vmatpush3.bf16.msra.mxu0 %v3848_v1  ;;  %3345 = vmatprep.subr.bf16.mxu1 %v3849_v2  ;;  %v3854_v7 = vld [vmem:[#allocation2 + $0x118] sm:$0xff]   ;;  %v3856_v9 = vld [vmem:[#allocation2 + $0x120] sm:$0xff]   ;;  %v3857_v10 = vld [vmem:[#allocation2 + $0x68] sm:$0xff]   ;;  %vm2791_vm6 = vcmask 1041409   ;;  %vm2794_vm7 = vcmask 1042434   ;;  %vm2797_vm8 = vcmask 1043459  }
  0x3b   : > { %3473 = vmatprep.subr.bf16.mxu0 %v3850_v3  ;;  %s3775_s27 = smul.u32 120, %s206_s26  ;;  %v3858_v11 = vld [vmem:[#allocation2 + $0x128] sm:$0xff]   ;;  %v3859_v20 = vld [vmem:[#allocation2 + $0x70] sm:$0xff]   ;;  %vm4201_vm2 = vmor %vm244_vm0, %vm245_vm1  ;;  %vm2800_vm9 = vcmask 1044484   ;;  %vm2803_vm10 = vcmask 1045509   ;;  %vm2806_vm11 = vcmask 1046534  }
  0x3c   : > { %v3860_v32 = vld [vmem:[#allocation2 + $0x130] sm:$0xff]   ;;  %v3861_v49 = vld [vmem:[#allocation2 + $0x78] sm:$0xff]   ;;  %v3863_v0 = vld [vmem:[#allocation2] sm:$0xff]   ;;  %vm2809_vm12 = vcmask 1047559   ;;  %s200_s6 = sand.u32 1, %s4023_s13   ;;  %s3198_s9 = sshll.u32 %s4031_s15, 8 }
  0x3d   : > { %3346 = vmatpush3.bf16.msra.mxu1 %v3849_v2  ;;  %s4166_s30 = scalar_lea.vmem %s4751_s0, %s3775_s27  ;;  %v3862_v54 = vld [vmem:[#allocation2 + $0x138] sm:$0xff]   ;;  %vm4352_vm5 = vmor %vm517_vm3, %vm518_vm4  ;;  %s2982_s7 = sshll.u32 %s200_s6, 4 }
  0x3e   : > { %3474 = vmatpush3.bf16.msra.mxu0 %v3850_v3  ;;  %3347 = vmatprep.subr.bf16.mxu1 %v3851_v4  ;;  %v4169_v12 = vld [vmem:[%s4166_s30] sm:$0xf]  ;;  %v4172_v13 = vld [vmem:[%s4166_s30 + $0x4] sm:$0xf]  ;;  %v4175_v14 = vld [vmem:[%s4166_s30 + $0x8] sm:$0x1]  ;;  %s4698_s19 = scalar_lea.hbm %s4754_s3, %s3198_s9 }
  0x3f   : > { %3475 = vmatprep.subr.bf16.mxu0 %v3852_v5  ;;  %v248_v15 = vshrl.u32 %v4169_v12, 16  ;;  %v251_v16 = vshll.u32 %v4169_v12, 16  ;;  %v257_v17 = vshll.u32 %v4172_v13, 16  ;;  %v261_v18 = vshrl.u32 %v4172_v13, 16  ;;  %v4182_v19 = vld [vmem:[%s4166_s30 + $0xc] sm:$0xf] }
  0x40   : > { %v267_v21 = vshll.u32 %v4175_v14, 16  ;;  %v4186_v22 = vld [vmem:[%s4166_s30 + $0x10] sm:$0xf]  ;;  %v4189_v23 = vld [vmem:[%s4166_s30 + $0x14] sm:$0x1]  ;;  %v272_v29 = vshrl.u32 %v4182_v19, 16 }
  0x41   : > { %3348 = vmatpush3.bf16.msra.mxu1 %v3851_v4  ;;  %v250_v24 = vrot.slane %v248_v15, 4  ;;  %v253_v25 = vrot.slane %v251_v16, 5  ;;  %v259_v26 = vrot.slane %v257_v17, 5  ;;  %v263_v27 = vrot.slane %v261_v18, 4  ;;  %v4197_v37 = vld [vmem:[%s4166_s30 + $0x18] sm:$0xf] }
  0x42   : > { %3476 = vmatpush3.bf16.msra.mxu0 %v3852_v5  ;;  %3349 = vmatprep.subr.bf16.mxu1 %v3853_v6  ;;  %v269_v28 = vrot.slane %v267_v21, 5  ;;  %v275_v30 = vshll.u32 %v4182_v19, 16  ;;  %v281_v31 = vshll.u32 %v4186_v22, 16  ;;  %v285_v35 = vshrl.u32 %v4186_v22, 16  ;;  %v4206_v42 = vld [vmem:[%s4166_s30 + $0x1c] sm:$0xf] }
  0x43   : > { %3477 = vmatprep.subr.bf16.mxu0 %v3854_v7  ;;  %v254_v33 = vor.u32 %v253_v25, %v250_v24  ;;  %v264_v34 = vor.u32 %v263_v27, %v259_v26  ;;  %v291_v36 = vshll.u32 %v4189_v23, 16  ;;  %v274_v39 = vrot.slane %v272_v29, 4  ;;  %v4210_v48 = vld [vmem:[%s4166_s30 + $0x20] sm:$0x1]  ;;  %v3864_v3 = vld [vmem:[#allocation2 + $0x140] sm:$0xff]   ;;  %v3865_v18 = vld [vmem:[#allocation2 + $0x8] sm:$0xff]  }
  0x44   : > { %v277_v40 = vrot.slane %v275_v30, 5  ;;  %v283_v41 = vrot.slane %v281_v31, 5  ;;  %v296_v43 = vshrl.u32 %v4197_v37, 16  ;;  %v287_v46 = vrot.slane %v285_v35, 4  ;;  %v3866_v35 = vld [vmem:[#allocation2 + $0x148] sm:$0xff]   ;;  %s4656_s8 = scalar_lea.vmem [#allocation5], %s2982_s7 }
  0x45   : > { %3350 = vmatpush3.bf16.msra.mxu1 %v3853_v6  ;;  %v255_v44 = vrot.slane %v254_v33, 4  ;;  %v265_v45 = vrot.slane %v264_v34, 4  ;;  %v293_v47 = vrot.slane %v291_v36, 5  ;;  %v299_v52 = vshll.u32 %v4197_v37, 16  ;;  %v4223_v6 = vld [vmem:[%s4166_s30 + $0x24] sm:$0xf] }
  0x46   : > { %3478 = vmatpush3.bf16.msra.mxu0 %v3854_v7  ;;  %3351 = vmatprep.subr.bf16.mxu1 %v3855_v8  ;;  %v278_v50 = vor.u32 %v277_v40, %v274_v39  ;;  %v298_v51 = vrot.slane %v296_v43, 4  ;;  %v305_v53 = vshll.u32 %v4206_v42, 16  ;;  %v288_v57 = vor.u32 %v287_v46, %v283_v41  ;;  %v4226_v7 = vld [vmem:[%s4166_s30 + $0x28] sm:$0xf]  ;;  %v4247_v33 = vld [vmem:[%s4166_s30 + $0x38] sm:$0x1] }
  0x47   : > { %3479 = vmatprep.subr.bf16.mxu0 %v3856_v9  ;;  %v260_v55 = vsel %vm4201_vm2, %v255_v44, %v259_v26  ;;  %v270_v56 = vsel %vm4201_vm2, %v265_v45, %v269_v28  ;;  %v309_v58 = vshrl.u32 %v4206_v42, 16  ;;  %v301_v61 = vrot.slane %v299_v52, 5  ;;  %v4239_v28 = vld [vmem:[%s4166_s30 + $0x30] sm:$0xf]  ;;  %v3867_v52 = vld [vmem:[#allocation2 + $0x10] sm:$0xff]   ;;  %s2881_s10 = sshll.u32 %s4656_s8, 4  ;;  %s4700_s10 = int_to_ptr.vmem [resolvable:$true] %s2881_s10 }
  0x48   : > { %v2994_v59 = vcombine.low %v260_v55, %v270_v56  ;;  %v279_v60 = vrot.slane %v278_v50, 4  ;;  %v307_v62 = vrot.slane %v305_v53, 5  ;;  %v289_v63 = vrot.slane %v288_v57, 4  ;;  %s4705_s15 = scalar_lea.sflag [#allocation4], %s200_s6  ;;  %s3957_s21 = scalar_lea.vmem %s4700_s10, 256 }
  0x49   : > { %3352 = vmatpush3.bf16.msra.mxu1 %v3855_v8  ;;  %v311_v1 = vrot.slane %v309_v58, 4  ;;  %v315_v2 = vshll.u32 %v4210_v48, 16  ;;  %v302_v5 = vor.u32 %v301_v61, %v298_v51  ;;  %v320_v15 = vshrl.u32 %v4223_v6, 16  ;;  %v3868_v58 = vld [vmem:[#allocation2 + $0x150] sm:$0xff]   ;;  %v3869_v61 = vld [vmem:[#allocation2 + $0x18] sm:$0xff]   ;;  %p3958_p8 = scmp.ne.s32.totalorder %s4700_s10, %s3957_s21  ;;  %p4770_p10 = scmp.ne.s32.totalorder %s4759_s22, 0 }
  0x4a   : > { %3480 = vmatpush3.bf16.msra.mxu0 %v3856_v9  ;;  %3353 = vmatprep.subr.bf16.mxu1 %v3857_v10  ;;  %v284_v4 = vsel %vm4201_vm2, %v279_v60, %v283_v41  ;;  %v294_v8 = vsel %vm4201_vm2, %v289_v63, %v293_v47  ;;  %v329_v21 = vshll.u32 %v4226_v7, 16  ;;  %v333_v26 = vshrl.u32 %v4226_v7, 16  ;;  %v4266_v63 = vld [vmem:[%s4166_s30 + $0x40] sm:$0xf]  ;;  %s4045_s23 = smov [#allocation5]  }
  0x4b   : > { %3481 = vmatprep.subr.bf16.mxu0 %v3858_v11  ;;  %3359 = vmatprep.mubr.bf16.mxu1 %v2994_v59  ;;  %v312_v9 = vor.u32 %v311_v1, %v307_v62  ;;  %v2995_v16 = vcombine.low %v284_v4, %v294_v8  ;;  %v303_v17 = vrot.slane %v302_v5, 4  ;;  %v322_v25 = vrot.slane %v320_v15, 4  ;;  %p3959_p11 = pnand %p3958_p8, %p4770_p10  ;;  %s3961_s26 = sshll.u32 %s4045_s23, 4  ;;  %s3962_s26 = int_to_ptr.vmem [resolvable:$false] %s3961_s26 }
  0x4c   : > { %v331_v31 = vrot.slane %v329_v21, 5  ;;  %v335_v36 = vrot.slane %v333_v26, 4  ;;  %v344_v40 = vshrl.u32 %v4239_v28, 16  ;;  %v347_v44 = vshll.u32 %v4239_v28, 16  ;;  %s3963_s27 = scalar_lea.vmem %s3962_s26, 512  ;;  %p3964_p1 = scmp.lt.s32.totalorder %s4700_s10, %s3962_s26 }
  0x4d   : > { %3354 = vmatpush3.bf16.msra.mxu1 %v3857_v10  ;;  %v317_v10 = vrot.slane %v315_v2, 5  ;;  %v313_v24 = vrot.slane %v312_v9, 4  ;;  %3487 = vmatprep.mubr.bf16.mxu0 %v2995_v16  ;;  %v308_v29 = vsel %vm4201_vm2, %v303_v17, %v307_v62  ;;  %v363_v50 = vshll.u32 %v4247_v33, 16  ;;  %v4263_v62 = vld [vmem:[%s4166_s30 + $0x3c] sm:$0xf]  ;;  %v3870_v9 = vld [vmem:[#allocation2 + $0x158] sm:$0xff]   ;;  %p3960_p13 = pneg %p3959_p11  ;;  %p3965_p3 = scmp.lt.s32.totalorder %s3963_s27, %s3957_s21 }
  0x4e   : > { %3482 = vmatpush3.bf16.msra.mxu0 %v3858_v11  ;;  %3355 = vmatprep.subr.bf16.mxu1 %v3859_v20  ;;  %v4231_v11 = vld [vmem:[%s4166_s30 + $0x2c] sm:$0x1]  ;;  %v336_v46 = vor.u32 %v335_v36, %v331_v31  ;;  %v346_v47 = vrot.slane %v344_v40, 4  ;;  %v349_v53 = vrot.slane %v347_v44, 5  ;;  %v371_v4 = vshll.u32 %v4263_v62, 16 }
  0x4f   : > { %3483 = vmatprep.subr.bf16.mxu0 %v3860_v32  ;;  %v339_v27 = vshll.u32 %v4231_v11, 16  ;;  %v318_v34 = vsel %vm4201_vm2, %v313_v24, %v317_v10  ;;  %v365_v57 = vrot.slane %v363_v50, 5  ;;  %v377_v10 = vshll.u32 %v4266_v63, 16  ;;  %v4284_v24 = vld [vmem:[%s4166_s30 + $0x4c] sm:$0xf]  ;;  %p3966_p5 = por %p3965_p3, %p3964_p1 }
  0x50   : > { %v4252_v41 = vcombine.low %v308_v29, %v318_v34  ;;  %v337_v55 = vrot.slane %v336_v46, 4  ;;  %v350_v60 = vor.u32 %v349_v53, %v346_v47  ;;  %v381_v15 = vshrl.u32 %v4266_v63, 16  ;;  %v3871_v29 = vld [vmem:[#allocation2 + $0x20] sm:$0xff]  }
  0x51   : > { %3356 = vmatpush3.bf16.msra.mxu1 %v3859_v20  ;;  %v323_v20 = vshll.u32 %v4223_v6, 16  ;;  %v341_v39 = vrot.slane %v339_v27, 5  ;;  %v379_v26 = vrot.slane %v377_v10, 5  ;;  %v3872_v46 = vld [vmem:[#allocation2 + $0x160] sm:$0xff]   ;;  %v405_v50 = vshrl.u32 %v4284_v24, 16  ;;  %p3967_p6 = pnand %p3966_p5, %p3960_p13 }
  0x52   : > { %3484 = vmatpush3.bf16.msra.mxu0 %v3860_v32  ;;  %3357 = vmatprep.subr.bf16.mxu1 %v3861_v49  ;;  %v4244_v32 = vld [vmem:[%s4166_s30 + $0x34] sm:$0xf]  ;;  %v351_v8 = vrot.slane %v350_v60, 4  ;;  %v383_v27 = vrot.slane %v381_v15, 4  ;;  %v4310_v60 = vld [vmem:[%s4166_s30 + $0x58] sm:$0xf] }
  0x53   : > { %3485 = vmatprep.subr.bf16.mxu0 %v3862_v54  ;;  %v325_v30 = vrot.slane %v323_v20, 5  ;;  %v353_v45 = vshll.u32 %v4244_v32, 16  ;;  %v342_v1 = vsel %vm4201_vm2, %v337_v55, %v341_v39  ;;  %v373_v20 = vrot.slane %v371_v4, 5 }
  0x55   : > { %3358 = vmatpush3.bf16.msra.mxu1 %v3861_v49  ;;  %v326_v43 = vor.u32 %v325_v30, %v322_v25  ;;  %v357_v49 = vshrl.u32 %v4244_v32, 16  ;;  %v4291_v30 = vld [vmem:[%s4166_s30 + $0x50] sm:$0x1] }
  0x56   : > { %3486 = vmatpush3.bf16.msra.mxu0 %v3862_v54  ;;  %3375 = vmatprep.subr.bf16.mxu1 %v3863_v0  ;;  %v355_v54 = vrot.slane %v353_v45, 5  ;;  %v401_v45 = vshll.u32 %v4284_v24, 16 }
  0x57   : > { %3503 = vmatprep.subr.bf16.mxu0 %v3864_v3  ;;  %v327_v51 = vrot.slane %v326_v43, 4  ;;  %v359_v56 = vrot.slane %v357_v49, 4  ;;  %v384_v43 = vor.u32 %v383_v27, %v379_v26 }
  0x58   : > { %3360 = vmatmul.mubr.bf16.vlgmr.msra.gmra.mrb[0].mxu1 %v2995_v16  ;;  %v4280_v16 = vld [vmem:[%s4166_s30 + $0x48] sm:$0xf]  ;;  %v356_v25 = vsel %vm4201_vm2, %v351_v8, %v355_v54  ;;  %v403_v53 = vrot.slane %v401_v45, 5  ;;  %v425_v8 = vshll.u32 %v4310_v60, 16  ;;  %v3875_v45 = vld [vmem:[#allocation2 + $0x30] sm:$0xff]  }
  0x59   : > { %3376 = vmatpush3.bf16.msra.mxu1 %v3863_v0  ;;  %3488 = vmatmul.mubr.bf16.vlgmr.msra.gmra.mrb[0].mxu0 %v4252_v41  ;;  %v332_v59 = vsel %vm4201_vm2, %v327_v51, %v331_v31  ;;  %v4269_v0 = vld [vmem:[%s4166_s30 + $0x44] sm:$0x1]  ;;  %v360_v2 = vor.u32 %v359_v56, %v355_v54  ;;  %v392_v31 = vshrl.u32 %v4280_v16, 16  ;;  %v395_v39 = vshll.u32 %v4280_v16, 16  ;;  %v4304_v54 = vld [vmem:[%s4166_s30 + $0x54] sm:$0xf] }
  0x5a   : > { %3377 = vmatprep.subr.bf16.mxu1 %v3865_v18  ;;  %3504 = vmatpush3.bf16.msra.mxu0 %v3864_v3  ;;  %v368_v3 = vshrl.u32 %v4263_v62, 16  ;;  %v4275_v5 = vcombine.low %v332_v59, %v342_v1  ;;  %v387_v21 = vshll.u32 %v4269_v0, 16  ;;  %v411_v51 = vshll.u32 %v4291_v30, 16  ;;  %v3873_v59 = vld [vmem:[#allocation2 + $0x28] sm:$0xff]  }
  0x5b   : > { %3363 = vmatprep.mubr.bf16.mxu1 %v4252_v41  ;;  %3505 = vmatprep.subr.bf16.mxu0 %v3866_v35  ;;  %v361_v17 = vrot.slane %v360_v2, 4  ;;  %v394_v44 = vrot.slane %v392_v31, 4  ;;  %v397_v49 = vrot.slane %v395_v39, 5  ;;  %v4313_v1 = vld [vmem:[%s4166_s30 + $0x5c] sm:$0x1]  ;;  %v419_v4 = vshll.u32 %v4304_v54, 16 }
  0x5c   : > { %3491 = vmatprep.mubr.bf16.mxu0 %v4275_v5  ;;  %v389_v36 = vrot.slane %v387_v21, 5  ;;  %v435_v27 = vshll.u32 %v4313_v1, 16  ;;  %v4328_v31 = vld [vmem:[%s4166_s30 + $0x64] sm:$0xf] }
  0x5d   : > { %3378 = vmatpush3.bf16.msra.mxu1 %v3865_v18  ;;  %v370_v18 = vrot.slane %v368_v3, 4  ;;  %v366_v34 = vsel %vm4201_vm2, %v361_v17, %v365_v57  ;;  %v398_v56 = vor.u32 %v397_v49, %v394_v44  ;;  %v407_v57 = vrot.slane %v405_v50, 4 }
  0x5e   : > { %3379 = vmatprep.subr.bf16.mxu1 %v3867_v52  ;;  %3506 = vmatpush3.bf16.msra.mxu0 %v3866_v35  ;;  %v4297_v40 = vcombine.low %v356_v25, %v366_v34  ;;  %v416_v3 = vshrl.u32 %v4304_v54, 16  ;;  %v421_v25 = vrot.slane %v419_v4, 5  ;;  %v437_v44 = vrot.slane %v435_v27, 5 }
  0x5f   : > { %3507 = vmatprep.subr.bf16.mxu0 %v3868_v58  ;;  %v374_v35 = vor.u32 %v373_v20, %v370_v18  ;;  %v399_v15 = vrot.slane %v398_v56, 4  ;;  %v408_v17 = vor.u32 %v407_v57, %v403_v53  ;;  %v429_v18 = vshrl.u32 %v4310_v60, 16  ;;  %v4324_v20 = vld [vmem:[%s4166_s30 + $0x60] sm:$0xf] }
  0x60   : > { %3364 = vmatmul.mubr.bf16.gmra.mrb[4].mxu1 %v4275_v5  ;;  %v418_v21 = vrot.slane %v416_v3, 4  ;;  %v440_v39 = vshrl.u32 %v4324_v20, 16  ;;  %v449_v49 = vshll.u32 %v4328_v31, 16 }
  0x61   : > { %3380 = vmatpush3.bf16.msra.mxu1 %v3867_v52  ;;  %v375_v47 = vrot.slane %v374_v35, 4  ;;  %3492 = vmatmul.mubr.bf16.gmra.mrb[4].mxu0 %v4297_v40  ;;  %v385_v52 = vrot.slane %v384_v43, 4  ;;  %v409_v34 = vrot.slane %v408_v17, 4  ;;  %v431_v35 = vrot.slane %v429_v18, 4 }
  0x62   : > { %3381 = vmatprep.subr.bf16.mxu1 %v3869_v61  ;;  %3508 = vmatpush3.bf16.msra.mxu0 %v3868_v58  ;;  %v413_v58 = vrot.slane %v411_v51, 5  ;;  %v422_v43 = vor.u32 %v421_v25, %v418_v21  ;;  %v451_v57 = vrot.slane %v449_v49, 5  ;;  %v529_v18 = vrot.slane %v4186_v22, 5 }
  0x63   : > { %3509 = vmatprep.subr.bf16.mxu0 %v3870_v9  ;;  %3367 = vmatprep.mubr.bf16.mxu1 %v4297_v40  ;;  %v380_v55 = vsel %vm4201_vm2, %v375_v47, %v379_v26  ;;  %v390_v2 = vsel %vm4201_vm2, %v385_v52, %v389_v36  ;;  %v427_v26 = vrot.slane %v425_v8, 5  ;;  %v4335_v36 = vld [vmem:[%s4166_s30 + $0x68] sm:$0x1]  ;;  %v443_v47 = vshll.u32 %v4324_v20, 16 }
  0x64   : > { %v4320_v10 = vcombine.low %v380_v55, %v390_v2  ;;  %v414_v50 = vsel %vm4201_vm2, %v409_v34, %v413_v58  ;;  %v442_v52 = vrot.slane %v440_v39, 4  ;;  %v3876_v2 = vld [vmem:[#allocation2 + $0x170] sm:$0xff]   ;;  %v459_v8 = vshll.u32 %v4335_v36, 16 }
  0x65   : > { %3382 = vmatpush3.bf16.msra.mxu1 %v3869_v61  ;;  %v3874_v61 = vld [vmem:[#allocation2 + $0x168] sm:$0xff]   ;;  %v432_v51 = vor.u32 %v431_v35, %v427_v26  ;;  %v445_v56 = vrot.slane %v443_v47, 5  ;;  %v532_v21 = vrot.slane %v4189_v23, 5  ;;  %v3010_v39 = vcombine.low %v4169_v12, %v4172_v13 }
  0x66   : > { %3383 = vmatprep.subr.bf16.mxu1 %v3871_v29  ;;  %3510 = vmatpush3.bf16.msra.mxu0 %v3870_v9  ;;  %v404_v9 = vsel %vm4201_vm2, %v399_v15, %v403_v53  ;;  %v453_v53 = vshrl.u32 %v4328_v31, 16  ;;  %v2985_v15 = vrot.slane %v4182_v19, 9  ;;  %v461_v27 = vrot.slane %v459_v8, 5 }
  0x67   : > { %3511 = vmatprep.subr.bf16.mxu0 %v3872_v46  ;;  %3495 = vmatprep.mubr.bf16.mxu0 %v4320_v10  ;;  %v4343_v55 = vcombine.low %v404_v9, %v414_v50  ;;  %v433_v3 = vrot.slane %v432_v51, 4  ;;  %v446_v58 = vor.u32 %v445_v56, %v442_v52  ;;  %v3878_v9 = vld [vmem:[#allocation2 + $0x178] sm:$0xff]   ;;  %v536_v47 = vrot.slane %v4206_v42, 5 }
  0x68   : > { %3368 = vmatmul.mubr.bf16.gmra.mrb[8].mxu1 %v4320_v10  ;;  %v455_v4 = vrot.slane %v453_v53, 4  ;;  %v539_v49 = vrot.slane %v4210_v48, 5  ;;  %v2986_v53 = vrot.slane %v4197_v37, 9  ;;  %v2987_v8 = vrot.slane %v4223_v6, 9 }
  0x69   : > { %3384 = vmatpush3.bf16.msra.mxu1 %v3871_v29  ;;  %v423_v29 = vrot.slane %v422_v43, 4  ;;  %3496 = vmatmul.mubr.bf16.gmra.mrb[8].mxu0 %v4343_v55  ;;  %v447_v35 = vrot.slane %v446_v58, 4  ;;  %v531_v43 = vrot.slane %v529_v18, 4 }
  0x6a   : > { %3512 = vmatpush3.bf16.msra.mxu0 %v3872_v46  ;;  %3385 = vmatprep.subr.bf16.mxu1 %v3873_v59  ;;  %v456_v25 = vor.u32 %v455_v4, %v451_v57  ;;  %v3882_v4 = vld [vmem:[#allocation2 + $0x180] sm:$0xff]  }
  0x6b   : > { %3513 = vmatprep.subr.bf16.mxu0 %v3874_v61  ;;  %v428_v46 = vsel %vm4201_vm2, %v423_v29, %v427_v26  ;;  %3371 = vmatprep.mubr.bf16.mxu1 %v4343_v55  ;;  %v3877_v26 = vld [vmem:[#allocation2 + $0x38] sm:$0xff]   ;;  %v452_v50 = vsel %vm4201_vm2, %v447_v35, %v451_v57  ;;  %v533_v51 = vsel %vm4352_vm5, %v531_v43, %v532_v21  ;;  %v538_v29 = vrot.slane %v536_v47, 4  ;;  %v3887_v35 = vld [vmem:[#allocation2 + $0x90] sm:$0xff]  }
  0x6c   : > { %v457_v23 = vrot.slane %v456_v25, 4  ;;  %v543_v57 = vrot.slane %v4226_v7, 5 }
  0x6d   : > { %3386 = vmatpush3.bf16.msra.mxu1 %v3873_v59  ;;  %v438_v59 = vsel %vm4201_vm2, %v433_v3, %v437_v44  ;;  %v4370_v44 = vcombine.low %v4324_v20, %v4328_v31  ;;  %v3881_v3 = vld [vmem:[#allocation2 + $0x80] sm:$0xff]   ;;  %v540_v58 = vsel %vm4352_vm5, %v538_v29, %v539_v49  ;;  %v3888_v49 = vld [vmem:[#allocation2 + $0x190] sm:$0xff]   ;;  %v571_v29 = vrot.slane %v4310_v60, 5 }
  0x6e   : > { %3514 = vmatpush3.bf16.msra.mxu0 %v3874_v61  ;;  %v4361_v34 = vcombine.low %v428_v46, %v438_v59  ;;  %3387 = vmatprep.subr.bf16.mxu1 %v3875_v45  ;;  %v530_v61 = vsel %vm4352_vm5, %v2985_v15, %v529_v18  ;;  %v462_v52 = vsel %vm4201_vm2, %v457_v23, %v461_v27  ;;  %v546_v15 = vrot.slane %v4231_v11, 5 }
  0x6f   : > { %3515 = vmatprep.subr.bf16.mxu0 %v3876_v2  ;;  %v4382_v56 = vcombine.low %v452_v50, %v462_v52  ;;  %v4384_v48 = vcombine.low %v530_v61, %v533_v51  ;;  %v537_v46 = vsel %vm4352_vm5, %v2986_v53, %v536_v47  ;;  %v4400_v18 = vcombine.low %v4197_v37, %v4206_v42  ;;  %v3889_v51 = vld [vmem:[#allocation2 + $0x98] sm:$0xff]  }
  0x70   : > { %3499 = vmatprep.mubr.bf16.mxu0 %v4361_v34  ;;  %3372 = vmatmul.mubr.bf16.gmra.mrb[12].mxu1 %v4361_v34  ;;  %v550_v11 = vrot.slane %v4244_v32, 5  ;;  %v557_v59 = vrot.slane %v4266_v63, 5  ;;  %v4410_v25 = vcombine.low %v537_v46, %v540_v58  ;;  %v2988_v37 = vrot.slane %v4239_v28, 9 }
  0x71   : > { %3388 = vmatpush3.bf16.msra.mxu1 %v3875_v45  ;;  %3391 = vmatprep.mubr.bf16.mxu1 %v3010_v39  ;;  %v4392_v45 = vcombine.low %v4182_v19, %v4186_v22  ;;  %v3883_v19 = vld [vmem:[#allocation2 + $0x88] sm:$0xff]   ;;  %v544_v22 = vsel %vm4352_vm5, %v2987_v8, %v543_v57  ;;  %v553_v27 = vrot.slane %v4247_v33, 5  ;;  %v2989_v39 = vrot.slane %v4263_v62, 9 }
  0x72   : > { %3516 = vmatpush3.bf16.msra.mxu0 %v3876_v2  ;;  %3389 = vmatprep.subr.bf16.mxu1 %v3877_v26  ;;  %v545_v2 = vrot.slane %v543_v57, 4  ;;  %v552_v42 = vrot.slane %v550_v11, 4  ;;  %v559_v43 = vrot.slane %v557_v59, 4  ;;  %v560_v23 = vrot.slane %v4269_v0, 5 }
  0x73   : > { %3517 = vmatprep.subr.bf16.mxu0 %v3878_v9  ;;  %3500 = vmatmul.mubr.bf16.gmra.mrb[12].mxu0 %v4382_v56  ;;  %v525_v61 = vrot.slane %v4175_v14, 5  ;;  %v4423_v47 = vcombine.low %v4223_v6, %v4226_v7  ;;  %v551_v33 = vsel %vm4352_vm5, %v2988_v37, %v550_v11  ;;  %v564_v0 = vrot.slane %v4284_v24, 5  ;;  %v3895_v37 = vld [vmem:[#allocation2 + $0xa8] sm:$0xff]  }
  0x74   : > { %3519 = vmatprep.mubr.bf16.mxu0 %v4384_v48  ;;  %v547_v21 = vsel %vm4352_vm5, %v545_v2, %v546_v15  ;;  %v554_v50 = vsel %vm4352_vm5, %v552_v42, %v553_v27  ;;  %v4433_v14 = vcombine.low %v4239_v28, %v4244_v32  ;;  %v558_v6 = vsel %vm4352_vm5, %v2989_v39, %v557_v59  ;;  %v3890_v32 = vld [vmem:[#allocation2 + $0x198] sm:$0xff]   ;;  %v3893_v2 = vld [vmem:[#allocation2 + $0xa0] sm:$0xff]   ;;  %v3899_v39 = vld [vmem:[#allocation2 + $0xb0] sm:$0xff]  }
  0x75   : > { %3390 = vmatpush3.bf16.msra.mxu1 %v3877_v26  ;;  %v3884_v26 = vld [vmem:[#allocation2 + $0x188] sm:$0xff]   ;;  %v2990_v7 = vrot.slane %v4280_v16, 9  ;;  %v567_v52 = vrot.slane %v4291_v30, 5  ;;  %v561_v53 = vsel %vm4352_vm5, %v559_v43, %v560_v23  ;;  %v522_v57 = vrot.slane %v4172_v13, 5  ;;  %v3894_v59 = vld [vmem:[#allocation2 + $0x1a0] sm:$0xff]   ;;  %v3900_v23 = vld [vmem:[#allocation2 + $0x1b0] sm:$0xff]  }
  0x76   : > { %3518 = vmatpush3.bf16.msra.mxu0 %v3878_v9  ;;  %3407 = vmatprep.subr.bf16.mxu1 %v3881_v3  ;;  %v4415_v9 = vcombine.low %v544_v22, %v547_v21  ;;  %v4445_v28 = vcombine.low %v551_v33, %v554_v50  ;;  %v4449_v15 = vcombine.low %v558_v6, %v561_v53  ;;  %v573_v13 = vrot.slane %v571_v29, 4  ;;  %v3904_v33 = vld [vmem:[#allocation2 + $0x1c0] sm:$0xff]   ;;  %v3905_v50 = vld [vmem:[#allocation2 + $0xc8] sm:$0xff]   ;;  %v3908_v6 = vld [vmem:[#allocation2 + $0x1d0] sm:$0xff]  }
  0x77   : > { %3535 = vmatprep.subr.bf16.mxu0 %v3882_v4  ;;  %v524_v8 = vrot.slane %v522_v57, 4  ;;  %v574_v46 = vrot.slane %v4313_v1, 5  ;;  %v4459_v11 = vcombine.low %v4263_v62, %v4266_v63  ;;  %v565_v22 = vsel %vm4352_vm5, %v2990_v7, %v564_v0  ;;  %v3909_v7 = vld [vmem:[#allocation2 + $0xd8] sm:$0xff]   ;;  %v3912_v53 = vld [vmem:[#allocation2 + $0x1e0] sm:$0xff]  }
  0x78   : > { %3392 = vmatmul.mubr.bf16.vlgmr.msra.gmra.mrb[0].mxu1 %v4392_v45  ;;  %v578_v1 = vrot.slane %v4328_v31, 5  ;;  %v4469_v62 = vcombine.low %v4280_v16, %v4284_v24  ;;  %v2992_v31 = vrot.slane %v4324_v20, 9  ;;  %v3896_v16 = vld [vmem:[#allocation2 + $0x1a8] sm:$0xff]   ;;  %v4486_v43 = vcombine.low %v4304_v54, %v4310_v60  ;;  %v3903_v60 = vld [vmem:[#allocation2 + $0xc0] sm:$0xff]  }
  0x79   : > { %3408 = vmatpush3.bf16.msra.mxu1 %v3881_v3  ;;  %3395 = vmatprep.mubr.bf16.mxu1 %v4400_v18  ;;  %v2984_v3 = vrot.slane %v4169_v12, 9  ;;  %v2991_v12 = vrot.slane %v4304_v54, 9  ;;  %v526_v58 = vsel %vm4352_vm5, %v524_v8, %v525_v61  ;;  %v575_v42 = vsel %vm4352_vm5, %v573_v13, %v574_v46  ;;  %v3901_v61 = vld [vmem:[#allocation2 + $0xb8] sm:$0xff]   ;;  %v3921_v13 = vld [vmem:[#allocation2 + $0x200] sm:$0xff]   ;;  %v3922_v46 = vld [vmem:[#allocation2 + $0x208] sm:$0xff]  }
  0x7a   : > { %3409 = vmatprep.subr.bf16.mxu1 %v3883_v19  ;;  %v579_v20 = vsel %vm4352_vm5, %v2992_v31, %v578_v1  ;;  %v3902_v54 = vld [vmem:[#allocation2 + $0x1b8] sm:$0xff]  }
  0x7b   : > { %3520 = vmatmul.mubr.bf16.vlgmr.msra.gmra.mrb[0].mxu0 %v4410_v25  ;;  %v523_v30 = vsel %vm4352_vm5, %v2984_v3, %v522_v57  ;;  %v572_v63 = vsel %vm4352_vm5, %v2991_v12, %v571_v29  ;;  %v3913_v29 = vld [vmem:[#allocation2 + $0xe8] sm:$0xff]   ;;  %v3916_v57 = vld [vmem:[#allocation2 + $0xf0] sm:$0xff]   ;;  %v3919_v8 = vld [vmem:[#allocation2 + $0xf8] sm:$0xff]  }
  0x7c   : > { %3536 = vmatpush3.bf16.msra.mxu0 %v3882_v4  ;;  %3523 = vmatprep.mubr.bf16.mxu0 %v4415_v9  ;;  %v566_v4 = vrot.slane %v564_v0, 4  ;;  %v4480_v24 = vcombine.low %v572_v63, %v575_v42  ;;  %v3907_v0 = vld [vmem:[#allocation2 + $0xd0] sm:$0xff]   ;;  %v3914_v3 = vld [vmem:[#allocation2 + $0x1e8] sm:$0xff]   ;;  %v3920_v12 = vld [vmem:[#allocation2 + $0x1f8] sm:$0xff]  }
  0x7d   : > { %3410 = vmatpush3.bf16.msra.mxu1 %v3883_v19  ;;  %3537 = vmatprep.subr.bf16.mxu0 %v3884_v26  ;;  %v3026_v19 = vcombine.low %v523_v30, %v526_v58  ;;  %v3918_v30 = vld [vmem:[#allocation2 + $0x1f0] sm:$0xff]  }
  0x7e   : > { %3411 = vmatprep.subr.bf16.mxu1 %v3887_v35  ;;  %v568_v21 = vsel %vm4352_vm5, %v566_v4, %v567_v52  ;;  %v3911_v52 = vld [vmem:[#allocation2 + $0xe0] sm:$0xff]   ;;  %v3923_v58 = vld [vmem:[#allocation2 + $0x210] sm:$0xff]  }
  0x7f   : > { %v4476_v27 = vcombine.low %v565_v22, %v568_v21  ;;  %v4513_v4 = vld [vmem:[%s4166_s30 + $0x70] sm:$0xf] }
  0x80   : > { %3396 = vmatmul.mubr.bf16.gmra.mrb[4].mxu1 %v4423_v47  ;;  %3538 = vmatpush3.bf16.msra.mxu0 %v3884_v26  ;;  %v580_v26 = vrot.slane %v578_v1, 4  ;;  %v477_v22 = vshrl.u32 %v4513_v4, 16  ;;  %v243_v1 = vld [vmem:[%s4166_s30 + $0x74] sm:$0x1] }
  0x81   : > { %3412 = vmatpush3.bf16.msra.mxu1 %v3887_v35  ;;  %3539 = vmatprep.subr.bf16.mxu0 %v3888_v49  ;;  %v581_v35 = vrot.slane %v4335_v36, 5  ;;  %v483_v42 = vshll.u32 %v243_v1, 16 }
  0x82   : > { %3413 = vmatprep.subr.bf16.mxu1 %v3889_v51  ;;  %3399 = vmatprep.mubr.bf16.mxu1 %v4433_v14 }
  0x83   : > { %3524 = vmatmul.mubr.bf16.gmra.mrb[4].mxu0 %v4445_v28  ;;  %v582_v36 = vsel %vm4352_vm5, %v580_v26, %v581_v35  ;;  %v3928_v35 = vld [vmem:[#allocation2 + $0x238] sm:$0xff]  }
  0x84   : > { %3540 = vmatpush3.bf16.msra.mxu0 %v3888_v49  ;;  %3527 = vmatprep.mubr.bf16.mxu0 %v4449_v15  ;;  %v4494_v49 = vcombine.low %v579_v20, %v582_v36 }
  0x85   : > { %3414 = vmatpush3.bf16.msra.mxu1 %v3889_v51  ;;  %3541 = vmatprep.subr.bf16.mxu0 %v3890_v32  ;;  %v3906_v51 = vld [vmem:[#allocation2 + $0x1c8] sm:$0xff]  }
  0x86   : > { %3415 = vmatprep.subr.bf16.mxu1 %v3893_v2 }
  0x88   : > { %3400 = vmatmul.mubr.bf16.gmra.mrb[8].mxu1 %v4459_v11  ;;  %3542 = vmatpush3.bf16.msra.mxu0 %v3890_v32  ;;  %v4510_v32 = vld [vmem:[%s4166_s30 + $0x6c] sm:$0xf] }
  0x89   : > { %3416 = vmatpush3.bf16.msra.mxu1 %v3893_v2  ;;  %3543 = vmatprep.subr.bf16.mxu0 %v3894_v59  ;;  %v3069_v2 = vcombine.low %v4510_v32, %v4513_v4  ;;  %v2993_v38 = vrot.slane %v4510_v32, 9 }
  0x8a   : > { %3417 = vmatprep.subr.bf16.mxu1 %v3895_v37  ;;  %3403 = vmatprep.mubr.bf16.mxu1 %v4469_v62 }
  0x8b   : > { %3528 = vmatmul.mubr.bf16.gmra.mrb[8].mxu0 %v4476_v27 }
  0x8c   : > { %3544 = vmatpush3.bf16.msra.mxu0 %v3894_v59  ;;  %3531 = vmatprep.mubr.bf16.mxu0 %v4480_v24  ;;  %v479_v59 = vrot.slane %v477_v22, 4 }
  0x8d   : > { %3418 = vmatpush3.bf16.msra.mxu1 %v3895_v37  ;;  %3545 = vmatprep.subr.bf16.mxu0 %v3896_v16  ;;  %v3925_v37 = vld [vmem:[#allocation2 + $0x220] sm:$0xff]  }
  0x8e   : > { %3419 = vmatprep.subr.bf16.mxu1 %v3899_v39 }
  0x90   : > { %3404 = vmatmul.mubr.bf16.gmra.mrb[12].mxu1 %v4486_v43  ;;  %3546 = vmatpush3.bf16.msra.mxu0 %v3896_v16 }
  0x91   : > { %3420 = vmatpush3.bf16.msra.mxu1 %v3899_v39  ;;  %3547 = vmatprep.subr.bf16.mxu0 %v3900_v23 }
  0x92   : > { %3421 = vmatprep.subr.bf16.mxu1 %v3901_v61  ;;  %3423 = vmatprep.mubr.bf16.mxu1 %v3026_v19  ;;  %v467_v19 = vshll.u32 %v4510_v32, 16 }
  0x93   : > { %3532 = vmatmul.mubr.bf16.gmra.mrb[12].mxu0 %v4494_v49 }
  0x94   : > { %3548 = vmatpush3.bf16.msra.mxu0 %v3900_v23  ;;  %3551 = vmatprep.mubr.bf16.mxu0 %v4400_v18 }
  0x95   : > { %3422 = vmatpush3.bf16.msra.mxu1 %v3901_v61  ;;  %3549 = vmatprep.subr.bf16.mxu0 %v3902_v54 }
  0x96   : > { %3439 = vmatprep.subr.bf16.mxu1 %v3903_v60 }
  0x98   : > { %3424 = vmatmul.mubr.bf16.vlgmr.msra.gmra.mrb[0].mxu1 %v4384_v48  ;;  %3550 = vmatpush3.bf16.msra.mxu0 %v3902_v54  ;;  %v3910_v48 = vld [vmem:[#allocation2 + $0x1d8] sm:$0xff]  }
  0x99   : > { %3440 = vmatpush3.bf16.msra.mxu1 %v3903_v60  ;;  %3567 = vmatprep.subr.bf16.mxu0 %v3904_v33 }
  0x9a   : > { %3441 = vmatprep.subr.bf16.mxu1 %v3905_v50  ;;  %3427 = vmatprep.mubr.bf16.mxu1 %v4410_v25 }
  0x9b   : > { %3552 = vmatmul.mubr.bf16.vlgmr.msra.gmra.mrb[0].mxu0 %v4423_v47 }
  0x9c   : > { %3568 = vmatpush3.bf16.msra.mxu0 %v3904_v33  ;;  %3555 = vmatprep.mubr.bf16.mxu0 %v4433_v14 }
  0x9d   : > { %3442 = vmatpush3.bf16.msra.mxu1 %v3905_v50  ;;  %3569 = vmatprep.subr.bf16.mxu0 %v3906_v51 }
  0x9e   : > { %3443 = vmatprep.subr.bf16.mxu1 %v3907_v0 }
  0xa0   : > { %3428 = vmatmul.mubr.bf16.gmra.mrb[4].mxu1 %v4415_v9  ;;  %3570 = vmatpush3.bf16.msra.mxu0 %v3906_v51 }
  0xa1   : > { %3444 = vmatpush3.bf16.msra.mxu1 %v3907_v0  ;;  %3571 = vmatprep.subr.bf16.mxu0 %v3908_v6 }
  0xa2   : > { %3445 = vmatprep.subr.bf16.mxu1 %v3909_v7  ;;  %3431 = vmatprep.mubr.bf16.mxu1 %v4445_v28 }
  0xa3   : > { %3556 = vmatmul.mubr.bf16.gmra.mrb[4].mxu0 %v4459_v11 }
  0xa4   : > { %3572 = vmatpush3.bf16.msra.mxu0 %v3908_v6  ;;  %3559 = vmatprep.mubr.bf16.mxu0 %v4469_v62 }
  0xa5   : > { %3446 = vmatpush3.bf16.msra.mxu1 %v3909_v7  ;;  %3573 = vmatprep.subr.bf16.mxu0 %v3910_v48 }
  0xa6   : > { %3447 = vmatprep.subr.bf16.mxu1 %v3911_v52 }
  0xa8   : > { %3432 = vmatmul.mubr.bf16.gmra.mrb[8].mxu1 %v4449_v15  ;;  %3574 = vmatpush3.bf16.msra.mxu0 %v3910_v48 }
  0xa9   : > { %3448 = vmatpush3.bf16.msra.mxu1 %v3911_v52  ;;  %3575 = vmatprep.subr.bf16.mxu0 %v3912_v53 }
  0xaa   : > { %3449 = vmatprep.subr.bf16.mxu1 %v3913_v29  ;;  %3435 = vmatprep.mubr.bf16.mxu1 %v4476_v27 }
  0xab   : > { %3560 = vmatmul.mubr.bf16.gmra.mrb[8].mxu0 %v4486_v43 }
  0xac   : > { %3576 = vmatpush3.bf16.msra.mxu0 %v3912_v53  ;;  %3563 = vmatprep.mubr.bf16.mxu0 %v4370_v44 }
  0xad   : > { %3450 = vmatpush3.bf16.msra.mxu1 %v3913_v29  ;;  %3577 = vmatprep.subr.bf16.mxu0 %v3914_v3 }
  0xae   : > { %3451 = vmatprep.subr.bf16.mxu1 %v3916_v57 }
  0xb0   : > { %3436 = vmatmul.mubr.bf16.gmra.mrb[12].mxu1 %v4480_v24  ;;  %3578 = vmatpush3.bf16.msra.mxu0 %v3914_v3 }
  0xb1   : > { %3452 = vmatpush3.bf16.msra.mxu1 %v3916_v57  ;;  %3579 = vmatprep.subr.bf16.mxu0 %v3918_v30 }
  0xb2   : > { %3453 = vmatprep.subr.bf16.mxu1 %v3919_v8  ;;  %3455 = vmatprep.mubr.bf16.mxu1 %v4392_v45  ;;  %v464_v45 = vshrl.u32 %v4510_v32, 16 }
  0xb3   : > { %3564 = vmatmul.mubr.bf16.gmra.mrb[12].mxu0 %v3069_v2  ;;  %v4044_v2 = vmov 1983009808  }
  0xb4   : > { %3580 = vmatpush3.bf16.msra.mxu0 %v3918_v30  ;;  %3583 = vmatprep.mubr.bf16.mxu0 %v4252_v41  ;;  %v473_v41 = vshll.u32 %v4513_v4, 16 }
  0xb5   : > { %3454 = vmatpush3.bf16.msra.mxu1 %v3919_v8  ;;  %3581 = vmatprep.subr.bf16.mxu0 %v3920_v12 }
  0xb6   : > { %3631 = vmatprep.subr.bf16.mxu1 %v3921_v13  ;;  %v475_v21 = vrot.slane %v473_v41, 5 }
  0xb8   : > { %3456 = vmatmul.mubr.bf16.vlgmr.msra.gmra.mrb[0].mxu1 %v4400_v18  ;;  %3582 = vmatpush3.bf16.msra.mxu0 %v3920_v12  ;;  %v3924_v18 = vld [vmem:[#allocation2 + $0x218] sm:$0xff]   ;;  %v480_v63 = vor.u32 %v479_v59, %v475_v21  ;;  %v2336_v12 = vunpack.c.l.s4 %v4044_v2 }
  0xb9   : > { %3639 = vmatpush3.bf16.msra.mxu1 %v3921_v13  ;;  %3599 = vmatprep.subr.bf16.mxu0 %v3921_v13 }
  0xba   : > { %3632 = vmatprep.subr.bf16.mxu1 %v3922_v46  ;;  %3459 = vmatprep.mubr.bf16.mxu1 %v4423_v47  ;;  %v469_v47 = vrot.slane %v467_v19, 5  ;;  %v481_v26 = vrot.slane %v480_v63, 4  ;;  %v4571_v19 = vld [vmem:[%s4753_s2] ss:$0 sm:$0xff] }
  0xbb   : > { %3584 = vmatmul.mubr.bf16.vlgmr.msra.gmra.mrb[0].mxu0 %v4275_v5  ;;  %v466_v5 = vrot.slane %v464_v45, 4 }
  0xbc   : > { %3600 = vmatpush3.bf16.msra.mxu0 %v3921_v13  ;;  %3587 = vmatprep.mubr.bf16.mxu0 %v4297_v40  ;;  %v2338_v13 = vlaneseq }
  0xbd   : > { %3640 = vmatpush3.bf16.msra.mxu1 %v3922_v46  ;;  %3601 = vmatprep.subr.bf16.mxu0 %v3922_v46  ;;  %v470_v40 = vor.u32 %v469_v47, %v466_v5  ;;  %v2337_v5 = vunpack.c.0.s8 %v2336_v12 }
  0xbe   : > { %3633 = vmatprep.subr.bf16.mxu1 %v3923_v58  ;;  %v2339_v47 = vshrl.u32 %v2338_v13, 7 }
  0xbf   : > { %v471_v31 = vrot.slane %v470_v40, 4 }
  0xc0   : > { %3460 = vmatmul.mubr.bf16.gmra.mrb[4].mxu1 %v4433_v14  ;;  %3602 = vmatpush3.bf16.msra.mxu0 %v3922_v46  ;;  %v3926_v14 = vld [vmem:[#allocation2 + $0x228] sm:$0xff]  }
  0xc1   : > { %3641 = vmatpush3.bf16.msra.mxu1 %v3923_v58  ;;  %3603 = vmatprep.subr.bf16.mxu0 %v3923_v58 }
  0xc2   : > { %3634 = vmatprep.subr.bf16.mxu1 %v3924_v18  ;;  %3463 = vmatprep.mubr.bf16.mxu1 %v4459_v11  ;;  %v485_v11 = vrot.slane %v483_v42, 5 }
  0xc3   : > { %3588 = vmatmul.mubr.bf16.gmra.mrb[4].mxu0 %v4320_v10  ;;  %v3927_v10 = vld [vmem:[#allocation2 + $0x230] sm:$0xff]  }
  0xc4   : > { %3604 = vmatpush3.bf16.msra.mxu0 %v3923_v58  ;;  %3591 = vmatprep.mubr.bf16.mxu0 %v4343_v55  ;;  %v476_v55 = vsel %vm4201_vm2, %v471_v31, %v475_v21 }
  0xc5   : > { %3642 = vmatpush3.bf16.msra.mxu1 %v3924_v18  ;;  %3605 = vmatprep.subr.bf16.mxu0 %v3924_v18 }
  0xc6   : > { %3635 = vmatprep.subr.bf16.mxu1 %v3925_v37 }
  0xc8   : > { %3464 = vmatmul.mubr.bf16.gmra.mrb[8].mxu1 %v4469_v62  ;;  %3606 = vmatpush3.bf16.msra.mxu0 %v3924_v18  ;;  %v486_v62 = vsel %vm4201_vm2, %v481_v26, %v485_v11 }
  0xc9   : > { %3643 = vmatpush3.bf16.msra.mxu1 %v3925_v37  ;;  %3607 = vmatprep.subr.bf16.mxu0 %v3925_v37  ;;  %v3078_v16 = vcombine.low %v476_v55, %v486_v62  ;;  %v4576_v62 = vsub.s32 %v2337_v5, %v2339_v47 }
  0xca   : > { %3636 = vmatprep.subr.bf16.mxu1 %v3926_v14  ;;  %3467 = vmatprep.mubr.bf16.mxu1 %v4486_v43 }
  0xcb   : > { %3592 = vmatmul.mubr.bf16.gmra.mrb[8].mxu0 %v4361_v34  ;;  %v585_v34 = vrot.slane %v4513_v4, 5 }
  0xcc   : > { %3608 = vmatpush3.bf16.msra.mxu0 %v3925_v37  ;;  %3595 = vmatprep.mubr.bf16.mxu0 %v4382_v56  ;;  %v588_v56 = vrot.slane %v243_v1, 5 }
  0xcd   : > { %3644 = vmatpush3.bf16.msra.mxu1 %v3926_v14  ;;  %3609 = vmatprep.subr.bf16.mxu0 %v3926_v14  ;;  %v587_v39 = vrot.slane %v585_v34, 4 }
  0xce   : > { %3637 = vmatprep.subr.bf16.mxu1 %v3927_v10 }
  0xd0   : > { %3468 = vmatmul.mubr.bf16.gmra.mrb[12].mxu1 %v4370_v44  ;;  %3610 = vmatpush3.bf16.msra.mxu0 %v3926_v14  ;;  %v586_v44 = vsel %vm4352_vm5, %v2993_v38, %v585_v34 }
  0xd1   : > { %3645 = vmatpush3.bf16.msra.mxu1 %v3927_v10  ;;  %3611 = vmatprep.subr.bf16.mxu0 %v3927_v10 }
  0xd2   : > { %3638 = vmatprep.subr.bf16.mxu1 %v3928_v35  ;;  %3623 = vmatprep.mubr.bf16.mxu1 %v4476_v27  ;;  %v589_v27 = vsel %vm4352_vm5, %v587_v39, %v588_v56 }
  0xd3   : > { %3596 = vmatmul.mubr.bf16.gmra.mrb[12].mxu0 %v3078_v16  ;;  %v3087_v43 = vcombine.low %v586_v44, %v589_v27 }
  0xd4   : > { %3612 = vmatpush3.bf16.msra.mxu0 %v3927_v10  ;;  %3615 = vmatprep.mubr.bf16.mxu0 %v4410_v25 }
  0xd5   : > { %3646 = vmatpush3.bf16.msra.mxu1 %v3928_v35  ;;  %3613 = vmatprep.subr.bf16.mxu0 %v3928_v35 }
  0xd8   : > { %3624 = vmatmul.mubr.bf16.vlgmr.msra.gmra.mrb[16].mxu1 %v4480_v24  ;;  %3614 = vmatpush3.bf16.msra.mxu0 %v3928_v35 }
  0xd9   : > { %3627 = vmatprep.mubr.bf16.mxu1 %v4494_v49 }
  0xdb   : > { %3616 = vmatmul.mubr.bf16.vlgmr.msra.gmra.mrb[0].mxu0 %v4415_v9 }
  0xdc   : > { %3619 = vmatprep.mubr.bf16.mxu0 %v4445_v28 }
  0xe0   : > { %3628 = vmatmul.mubr.bf16.gmra.mrb[20].mxu1 %v3087_v43 }
  0xe3   : > { %3620 = vmatmul.mubr.bf16.gmra.mrb[4].mxu0 %v4449_v15 }
 0x18b   : > { %v3457_v25 = vpop.f32.mrb[0].mxu1 }
 0x18c   : > { %v1290_v20 = vpop.f32.mrb[1].mxu1 }
 0x18d   : > { %v3458_v24 = vpop.f32.mrb[2].mxu1 }
 0x18e   : > { %v1293_v36 = vpop.f32.mrb[3].mxu1 }
 0x193   : > { %v4556_v23 = vpop.f32.mrb[4].mxu1 }
 0x194   : > { %v4558_v61 = vpop.f32.mrb[5].mxu1 }
 0x195   : > { %v4560_v49 = vpop.f32.mrb[6].mxu1 }
 0x196   : > { %v4562_v17 = vpop.f32.mrb[7].mxu1 }
 0x19b   : > { %v3465_v54 = vpop.f32.mrb[8].mxu1 }
 0x19c   : > { %v1322_v9 = vpop.f32.mrb[9].mxu1 }
 0x19d   : > { %v3466_v60 = vpop.f32.mrb[10].mxu1 }
 0x19e   : > { %v1325_v33 = vpop.f32.mrb[11].mxu1  ;;  %v3593_v28 = vpop.f32.mrb[8].mxu0 }
 0x19f   : > { %v3655_v50 = vadd.f32 %v3593_v28, %v3465_v54  ;;  %v2050_v51 = vpop.f32.mrb[9].mxu0 }
 0x1a0   : > { %v3657_v15 = vadd.f32 %v2050_v51, %v1322_v9  ;;  %v3594_v0 = vpop.f32.mrb[10].mxu0 }
 0x1a1   : > { %v3659_v6 = vadd.f32 %v3594_v0, %v3466_v60  ;;  %v2053_v7 = vpop.f32.mrb[11].mxu0 }
 0x1a2   : > { %v3661_v48 = vadd.f32 %v2053_v7, %v1325_v33 }
 0x1a3   : > { %v3469_v52 = vpop.f32.mrb[12].mxu1 }
 0x1a4   : > { %v1338_v53 = vpop.f32.mrb[13].mxu1 }
 0x1a5   : > { %v3470_v29 = vpop.f32.mrb[14].mxu1 }
 0x1a6   : > { %v1341_v3 = vpop.f32.mrb[15].mxu1  ;;  %v3597_v57 = vpop.f32.mrb[12].mxu0 }
 0x1a7   : > { %v3663_v32 = vadd.f32 %v3597_v57, %v3469_v52  ;;  %v2066_v4 = vpop.f32.mrb[13].mxu0 }
 0x1a8   : > { %v3665_v30 = vadd.f32 %v2066_v4, %v1338_v53  ;;  %v3598_v8 = vpop.f32.mrb[14].mxu0 }
 0x1a9   : > { %v4564_v46 = vadd.f32 %v3598_v8, %v3470_v29  ;;  %v2069_v58 = vpop.f32.mrb[15].mxu0 }
 0x1aa   : > { %v4566_v45 = vadd.f32 %v2069_v58, %v1341_v3 }
 0x1ab   : > { %v3625_v22 = vpop.f32.mrb[16].mxu1 }
 0x1ac   : > { %v3656_v41 = vadd.f32 %v3655_v50, %v3625_v22  ;;  %v2232_v18 = vpop.f32.mrb[17].mxu1 }
 0x1ad   : > { %v3658_v21 = vadd.f32 %v3657_v15, %v2232_v18  ;;  %v3626_v59 = vpop.f32.mrb[18].mxu1 }
 0x1ae   : > { %v2296_v1 = vadd.f32 %v3656_v41, %v4571_v19  ;;  %v3660_v37 = vadd.f32 %v3659_v6, %v3626_v59  ;;  %v2235_v40 = vpop.f32.mrb[19].mxu1  ;;  %v3617_v63 = vpop.f32.mrb[0].mxu0 }
 0x1af   : > { %v2294_v42 = vadd.f32 %v3658_v21, %v4571_v19  ;;  %v3662_v14 = vadd.f32 %v3661_v48, %v2235_v40  ;;  %v3647_v31 = vadd.f32 %v3617_v63, %v3457_v25  ;;  %v2200_v11 = vpop.f32.mrb[1].mxu0 }
 0x1b0   : > { %v2312_v26 = vmax.f32 %v2296_v1, 0.0  ;;  %v2297_v10 = vadd.f32 %v3660_v37, %v4571_v19  ;;  %v3648_v55 = vadd.f32 %v2200_v11, %v1290_v20  ;;  %v3618_v16 = vpop.f32.mrb[2].mxu0 }
 0x1b1   : > { %v2310_v35 = vmax.f32 %v2294_v42, 0.0  ;;  %v2295_v34 = vadd.f32 %v3662_v14, %v4571_v19  ;;  %v2288_v38 = vadd.f32 %v3647_v31, %v4571_v19  ;;  %v3649_v39 = vadd.f32 %v3618_v16, %v3458_v24  ;;  %v2203_v44 = vpop.f32.mrb[3].mxu0 }
 0x1b2   : > { %v2313_v56 = vmax.f32 %v2297_v10, 0.0  ;;  %v2286_v27 = vadd.f32 %v3648_v55, %v4571_v19  ;;  %v3650_v25 = vadd.f32 %v2203_v44, %v1293_v36 }
 0x1b3   : > { %v2322_v43 = vmax.f32 %v2310_v35, %v2312_v26  ;;  %v2311_v54 = vmax.f32 %v2295_v34, 0.0  ;;  %v3629_v9 = vpop.f32.mrb[20].mxu1  ;;  %v2304_v60 = vmax.f32 %v2288_v38, 0.0  ;;  %v2289_v20 = vadd.f32 %v3649_v39, %v4571_v19 }
 0x1b4   : > { %v3664_v33 = vadd.f32 %v3663_v32, %v3629_v9  ;;  %v2248_v28 = vpop.f32.mrb[21].mxu1  ;;  %v2302_v50 = vmax.f32 %v2286_v27, 0.0  ;;  %v2287_v0 = vadd.f32 %v3650_v25, %v4571_v19 }
 0x1b5   : > { %v2402_v51 = vcombine.high %v2322_v43, %v2322_v43  ;;  %v2409_v15 = vrot.slane %v2322_v43, %v4576_v62  ;;  %v4584_v24 = vpop.f32.mrb[22].mxu1  ;;  %v2305_v6 = vmax.f32 %v2289_v20, 0.0  ;;  %v2323_v7 = vmax.f32 %v2311_v54, %v2313_v56 }
 0x1b6   : > { %v4587_v48 = vadd.f32 %v3664_v33, %v4571_v19  ;;  %v4589_v36 = vadd.f32 %v3665_v30, %v2248_v28  ;;  %v4591_v52 = vpop.f32.mrb[23].mxu1  ;;  %v2318_v53 = vmax.f32 %v2302_v50, %v2304_v60  ;;  %v3621_v32 = vpop.f32.mrb[4].mxu0  ;;  %v2303_v4 = vmax.f32 %v2287_v0, 0.0 }
 0x1b7   : > { %v2416_v29 = vrot.slane %v2402_v51, %v4576_v62  ;;  %v2417_v3 = vcombine.high %v2409_v15, %v2409_v15  ;;  %v3113_v57 = vrot.slane %v2409_v15, 9  ;;  %v2419_v8 = vcombine.high %v2323_v7, %v2323_v7  ;;  %v4600_v13 = vpop.f32.mrb[5].mxu0 }
 0x1b8   : > { %v4595_v2 = vrot.slane %v2323_v7, %v4576_v62  ;;  %v4598_v12 = vadd.f32 %v3621_v32, %v4556_v23  ;;  %v2334_v30 = vcombine.high %v2318_v53, %v2318_v53  ;;  %v2341_v58 = vrot.slane %v2318_v53, %v4576_v62  ;;  %v4603_v18 = vpop.f32.mrb[6].mxu0 }
 0x1b9   : > { %v2418_v22 = vcombine.high %v2416_v29, %v2416_v29  ;;  %v3114_v41 = vrot.slane %v2417_v3, 9  ;;  %v3115_v5 = vrot.slane %v2416_v29, 9  ;;  %v2614_v47 = vmax.f32 %v2409_v15, %v3113_v57  ;;  %v4608_v1 = vpop.f32.mrb[7].mxu0 }
 0x1ba   : > { %v2319_v21 = vmax.f32 %v2303_v4, %v2305_v6  ;;  %v4606_v59 = vrot.slane %v2419_v8, %v4576_v62  ;;  %v2348_v23 = vrot.slane %v2334_v30, %v4576_v62  ;;  %v2349_v37 = vcombine.high %v2341_v58, %v2341_v58 }
 0x1bb   : > { %v3097_v40 = vrot.slane %v2341_v58, 9  ;;  %v3116_v63 = vrot.slane %v2418_v22, 9  ;;  %v2615_v42 = vmax.f32 %v2417_v3, %v3114_v41  ;;  %v2616_v14 = vmax.f32 %v2416_v29, %v3115_v5 }
 0x1bc   : > { %v3182_v31 = vpack.c.bf16 %v2614_v47, %v2614_v47  ;;  %v2351_v26 = vcombine.high %v2319_v21, %v2319_v21  ;;  %v2350_v11 = vcombine.high %v2348_v23, %v2348_v23  ;;  %v3098_v10 = vrot.slane %v2349_v37, 9 }
 0x1bd   : > { %v3099_v55 = vrot.slane %v2348_v23, 9  ;;  %v2598_v35 = vmax.f32 %v2341_v58, %v3097_v40  ;;  %v2617_v16 = vmax.f32 %v2418_v22, %v3116_v63  ;;  %v3183_v34 = vpack.c.bf16 %v2615_v42, %v2615_v42 }
 0x1be   : > { %v3184_v38 = vpack.c.bf16 %v2616_v14, %v2616_v14  ;;  %v2774_v39 = vunpack.c.l.b16 %v3182_v31  ;;  %v3100_v56 = vrot.slane %v2350_v11, 9  ;;  %v2599_v44 = vmax.f32 %v2349_v37, %v3098_v10 }
 0x1bf   : > { %v2600_v27 = vmax.f32 %v2348_v23, %v3099_v55  ;;  %v3166_v43 = vpack.c.bf16 %v2598_v35, %v2598_v35  ;;  %v3185_v25 = vpack.c.bf16 %v2617_v16, %v2617_v16  ;;  %v2775_v54 = vunpack.c.l.b16 %v3183_v34 }
 0x1c0   : > { %v2776_v9 = vunpack.c.l.b16 %v3184_v38  ;;  %v2358_v60 = vrot.slane %v2319_v21, %v4576_v62  ;;  %v2601_v20 = vmax.f32 %v2350_v11, %v3100_v56  ;;  %v3167_v33 = vpack.c.bf16 %v2599_v44, %v2599_v44 }
 0x1c1   : > { %v3168_v28 = vpack.c.bf16 %v2600_v27, %v2600_v27  ;;  %v2758_v50 = vunpack.c.l.b16 %v3166_v43  ;;  %v4612_v51 = vunpack.c.l.b16 %v3185_v25  ;;  %v2825_v15 = vrot.slane %v2775_v54, 7 }
 0x1c2   : > { %v2827_v0 = vrot.slane %v2776_v9, 6  ;;  %v2365_v6 = vrot.slane %v2351_v26, %v4576_v62  ;;  %v3169_v7 = vpack.c.bf16 %v2601_v20, %v2601_v20  ;;  %v2759_v53 = vunpack.c.l.b16 %v3167_v33 }
 0x1c3   : > { %v2760_v29 = vunpack.c.l.b16 %v3168_v28  ;;  %v2366_v3 = vcombine.high %v2358_v60, %v2358_v60  ;;  %v2826_v57 = vsel %vm2791_vm6, %v2825_v15, %v2774_v39  ;;  %v2829_v32 = vrot.slane %v4612_v51, 5 }
 0x1c4   : > { %v2367_v4 = vcombine.high %v2365_v6, %v2365_v6  ;;  %v3101_v8 = vrot.slane %v2358_v60, 9  ;;  %v2761_v30 = vunpack.c.l.b16 %v3169_v7  ;;  %v2790_v58 = vrot.slane %v2759_v53, 7 }
 0x1c5   : > { %v2793_v22 = vrot.slane %v2760_v29, 6  ;;  %v2828_v41 = vsel %vm2794_vm7, %v2827_v0, %v2826_v57  ;;  %v3102_v5 = vrot.slane %v2366_v3, 9  ;;  %v3103_v47 = vrot.slane %v2365_v6, 9 }
 0x1c6   : > { %v3104_v21 = vrot.slane %v2367_v4, 9  ;;  %v2602_v23 = vmax.f32 %v2358_v60, %v3101_v8  ;;  %v2792_v37 = vsel %vm2791_vm6, %v2790_v58, %v2758_v50  ;;  %v2796_v40 = vrot.slane %v2761_v30, 5 }
 0x1c7   : > { %v2434_v63 = vcombine.high %v4595_v2, %v4595_v2  ;;  %v2435_v42 = vcombine.high %v4606_v59, %v4606_v59  ;;  %v2795_v14 = vsel %vm2794_vm7, %v2793_v22, %v2792_v37  ;;  %v2603_v31 = vmax.f32 %v2366_v3, %v3102_v5 }
 0x1c8   : > { %v2604_v26 = vmax.f32 %v2365_v6, %v3103_v47  ;;  %v2605_v11 = vmax.f32 %v2367_v4, %v3104_v21  ;;  %v3170_v10 = vpack.c.bf16 %v2602_v23, %v2602_v23  ;;  %v2798_v55 = vsel %vm2797_vm8, %v2796_v40, %v2795_v14 }
 0x1c9   : > { %v3117_v35 = vrot.slane %v4595_v2, 9  ;;  %v3118_v16 = vrot.slane %v2434_v63, 9  ;;  %v3171_v34 = vpack.c.bf16 %v2603_v31, %v2603_v31  ;;  %v3119_v56 = vrot.slane %v4606_v59, 9 }
 0x1ca   : > { %v3172_v38 = vpack.c.bf16 %v2604_v26, %v2604_v26  ;;  %v3173_v39 = vpack.c.bf16 %v2605_v11, %v2605_v11  ;;  %v2762_v44 = vunpack.c.l.b16 %v3170_v10  ;;  %v3120_v27 = vrot.slane %v2435_v42, 9 }
 0x1cb   : > { %v2618_v43 = vmax.f32 %v4595_v2, %v3117_v35  ;;  %v2619_v25 = vmax.f32 %v2434_v63, %v3118_v16  ;;  %v2763_v54 = vunpack.c.l.b16 %v3171_v34  ;;  %v2620_v20 = vmax.f32 %v4606_v59, %v3119_v56 }
 0x1cc   : > { %v2764_v9 = vunpack.c.l.b16 %v3172_v38  ;;  %v2765_v60 = vunpack.c.l.b16 %v3173_v39  ;;  %v2799_v33 = vrot.slane %v2762_v44, 4  ;;  %v2621_v28 = vmax.f32 %v2435_v42, %v3120_v27 }
 0x1cd   : > { %v3186_v50 = vpack.c.bf16 %v2618_v43, %v2618_v43  ;;  %v3187_v51 = vpack.c.bf16 %v2619_v25, %v2619_v25  ;;  %v2802_v15 = vrot.slane %v2763_v54, 3  ;;  %v3188_v7 = vpack.c.bf16 %v2620_v20, %v2620_v20 }
 0x1ce   : > { %v2805_v0 = vrot.slane %v2764_v9, 2  ;;  %v2808_v6 = vrot.slane %v2765_v60, 1  ;;  %v2801_v53 = vsel %vm2800_vm9, %v2799_v33, %v2798_v55  ;;  %v3189_v29 = vpack.c.bf16 %v2621_v28, %v2621_v28 }
 0x1cf   : > { %v2778_v2 = vunpack.c.l.b16 %v3186_v50  ;;  %v2779_v3 = vunpack.c.l.b16 %v3187_v51  ;;  %v2804_v57 = vsel %vm2803_vm10, %v2802_v15, %v2801_v53  ;;  %v2780_v4 = vunpack.c.l.b16 %v3188_v7 }
 0x1d0   : > { %v2830_v59 = vsel %vm2797_vm8, %v2829_v32, %v2828_v41  ;;  %v2292_v8 = vadd.f32 %v4598_v12, %v4571_v19  ;;  %v2807_v30 = vsel %vm2806_vm11, %v2805_v0, %v2804_v57  ;;  %v2781_v58 = vunpack.c.l.b16 %v3189_v29 }
 0x1d1   : > { %v2831_v22 = vrot.slane %v2778_v2, 4  ;;  %v2833_v5 = vrot.slane %v2779_v3, 3  ;;  %v2810_v47 = vsel %vm2809_vm12, %v2808_v6, %v2807_v30  ;;  %v2835_v21 = vrot.slane %v2780_v4, 2 }
 0x1d2   : > { %v2308_v23 = vmax.f32 %v2292_v8, 0.0  ;;  %v2316_v37 = vmax.f32 %v4587_v48, 0.0  ;;  %v2853_v40 = vpack.c.b16 %v2810_v47, %v2810_v47  ;;  %v2837_v42 = vrot.slane %v2781_v58, 1 }
 0x1d3   : > { %v2832_v63 = vsel %vm2800_vm9, %v2831_v22, %v2830_v59  ;;  %v3652_v32 = vadd.f32 %v4600_v13, %v4558_v61  ;;  %v2298_v41 = vadd.f32 %v4589_v36, %v4571_v19  ;;  %v3653_v14 = vadd.f32 %v4603_v18, %v4560_v49 }
 0x1d4   : > { %v2834_v12 = vsel %vm2803_vm10, %v2833_v5, %v2832_v63  ;;  %v3668_v31 = vadd.f32 %v4564_v46, %v4584_v24  ;;  %v3654_v11 = vadd.f32 %v4608_v1, %v4562_v17  ;;  %v3670_v61 = vadd.f32 %v4566_v45, %v4591_v52  ;;  %2861 = vst [vmem:[%s4656_s8] sm:$0xf] %v2853_v40 }
 0x1d5   : > { %v2836_v48 = vsel %vm2806_vm11, %v2835_v21, %v2834_v12  ;;  %v2290_v26 = vadd.f32 %v3652_v32, %v4571_v19  ;;  %v2314_v36 = vmax.f32 %v2298_v41, 0.0  ;;  %v2293_v46 = vadd.f32 %v3653_v14, %v4571_v19 }
 0x1d6   : > { %v2838_v49 = vsel %vm2809_vm12, %v2837_v42, %v2836_v48  ;;  %v2301_v24 = vadd.f32 %v3668_v31, %v4571_v19  ;;  %v2291_v10 = vadd.f32 %v3654_v11, %v4571_v19  ;;  %v2299_v17 = vadd.f32 %v3670_v61, %v4571_v19 }
 0x1d7   : > { %v2855_v13 = vpack.c.b16 %v2838_v49, %v2838_v49  ;;  %v2306_v18 = vmax.f32 %v2290_v26, 0.0  ;;  %v2324_v1 = vmax.f32 %v2314_v36, %v2316_v37  ;;  %v2309_v45 = vmax.f32 %v2293_v46, 0.0 }
 0x1d8   : > { %v2317_v52 = vmax.f32 %v2301_v24, 0.0  ;;  %v2307_v35 = vmax.f32 %v2291_v10, 0.0  ;;  %v2315_v16 = vmax.f32 %v2299_v17, 0.0 }
 0x1d9   : > { %v2320_v55 = vmax.f32 %v2306_v18, %v2308_v23  ;;  %2863 = vst [vmem:[%s4656_s8 + $0x8] sm:$0xf] %v2855_v13  ;;  %v2436_v34 = vcombine.high %v2324_v1, %v2324_v1  ;;  %v2443_v38 = vrot.slane %v2324_v1, %v4576_v62 }
 0x1da   : > { %v2321_v44 = vmax.f32 %v2307_v35, %v2309_v45  ;;  %v4667_v27 = vmax.f32 %v2315_v16, %v2317_v52 }
 0x1db   : > { %v2368_v39 = vcombine.high %v2320_v55, %v2320_v55  ;;  %v2375_v56 = vrot.slane %v2320_v55, %v4576_v62  ;;  %v2450_v43 = vrot.slane %v2436_v34, %v4576_v62  ;;  %v2451_v25 = vcombine.high %v2443_v38, %v2443_v38 }
 0x1dc   : > { %v3121_v19 = vrot.slane %v2443_v38, 9  ;;  %v2385_v2 = vcombine.high %v2321_v44, %v2321_v44  ;;  %v2392_v63 = vrot.slane %v2321_v44, %v4576_v62 }
 0x1dd   : > { %v2382_v54 = vrot.slane %v2368_v39, %v4576_v62  ;;  %v2383_v9 = vcombine.high %v2375_v56, %v2375_v56  ;;  %v3105_v60 = vrot.slane %v2375_v56, 9  ;;  %v2452_v20 = vcombine.high %v2450_v43, %v2450_v43 }
 0x1de   : > { %v3122_v33 = vrot.slane %v2451_v25, 9  ;;  %v3123_v28 = vrot.slane %v2450_v43, 9  ;;  %v2622_v50 = vmax.f32 %v2443_v38, %v3121_v19  ;;  %v2399_v41 = vrot.slane %v2385_v2, %v4576_v62 }
 0x1df   : > { %v2384_v51 = vcombine.high %v2382_v54, %v2382_v54  ;;  %v3106_v15 = vrot.slane %v2383_v9, 9  ;;  %v3107_v0 = vrot.slane %v2382_v54, 9  ;;  %v2606_v6 = vmax.f32 %v2375_v56, %v3105_v60 }
 0x1e0   : > { %v3124_v7 = vrot.slane %v2452_v20, 9  ;;  %v2623_v53 = vmax.f32 %v2451_v25, %v3122_v33  ;;  %v2624_v29 = vmax.f32 %v2450_v43, %v3123_v28  ;;  %v3190_v59 = vpack.c.bf16 %v2622_v50, %v2622_v50 }
 0x1e1   : > { %v3108_v3 = vrot.slane %v2384_v51, 9  ;;  %v2607_v57 = vmax.f32 %v2383_v9, %v3106_v15  ;;  %v2608_v4 = vmax.f32 %v2382_v54, %v3107_v0  ;;  %v3174_v8 = vpack.c.bf16 %v2606_v6, %v2606_v6 }
 0x1e2   : > { %v2625_v30 = vmax.f32 %v2452_v20, %v3124_v7  ;;  %v3191_v58 = vpack.c.bf16 %v2623_v53, %v2623_v53  ;;  %v3192_v22 = vpack.c.bf16 %v2624_v29, %v2624_v29  ;;  %v2782_v31 = vunpack.c.l.b16 %v3190_v59 }
 0x1e3   : > { %v2609_v5 = vmax.f32 %v2384_v51, %v3108_v3  ;;  %v3175_v47 = vpack.c.bf16 %v2607_v57, %v2607_v57  ;;  %v3176_v21 = vpack.c.bf16 %v2608_v4, %v2608_v4  ;;  %v2766_v14 = vunpack.c.l.b16 %v3174_v8 }
 0x1e4   : > { %v3193_v23 = vpack.c.bf16 %v2625_v30, %v2625_v30  ;;  %v2783_v37 = vunpack.c.l.b16 %v3191_v58  ;;  %v2784_v40 = vunpack.c.l.b16 %v3192_v22  ;;  %v2400_v26 = vcombine.high %v2392_v63, %v2392_v63 }
 0x1e5   : > { %v3177_v42 = vpack.c.bf16 %v2609_v5, %v2609_v5  ;;  %v2767_v32 = vunpack.c.l.b16 %v3175_v47  ;;  %v2768_v12 = vunpack.c.l.b16 %v3176_v21  ;;  %v2401_v36 = vcombine.high %v2399_v41, %v2399_v41 }
 0x1e6   : > { %v2839_v48 = vrot.slane %v2783_v37, 7  ;;  %v2785_v46 = vunpack.c.l.b16 %v3193_v23  ;;  %v3109_v24 = vrot.slane %v2392_v63, 9  ;;  %v3110_v13 = vrot.slane %v2400_v26, 9 }
 0x1e7   : > { %v2769_v11 = vunpack.c.l.b16 %v3177_v42  ;;  %v2811_v61 = vrot.slane %v2767_v32, 7  ;;  %v2813_v49 = vrot.slane %v2768_v12, 6  ;;  %v2841_v17 = vrot.slane %v2784_v40, 6 }
 0x1e8   : > { %v2840_v10 = vsel %vm2791_vm6, %v2839_v48, %v2782_v31  ;;  %v3111_v1 = vrot.slane %v2399_v41, 9  ;;  %v3112_v52 = vrot.slane %v2401_v36, 9  ;;  %v2610_v55 = vmax.f32 %v2392_v63, %v3109_v24 }
 0x1e9   : > { %v2812_v18 = vsel %vm2791_vm6, %v2811_v61, %v2766_v14  ;;  %v2815_v45 = vrot.slane %v2769_v11, 5  ;;  %v2611_v35 = vmax.f32 %v2400_v26, %v3110_v13  ;;  %v2453_v38 = vcombine.high %v4667_v27, %v4667_v27 }
 0x1ea   : > { %v2814_v16 = vsel %vm2794_vm7, %v2813_v49, %v2812_v18  ;;  %v2612_v34 = vmax.f32 %v2399_v41, %v3111_v1  ;;  %v2460_v39 = vrot.slane %v4667_v27, %v4576_v62  ;;  %v2843_v56 = vrot.slane %v2785_v46, 5 }
 0x1eb   : > { %v2613_v44 = vmax.f32 %v2401_v36, %v3112_v52  ;;  %v3178_v43 = vpack.c.bf16 %v2610_v55, %v2610_v55  ;;  %v3179_v25 = vpack.c.bf16 %v2611_v35, %v2611_v35  ;;  %v2467_v54 = vrot.slane %v2453_v38, %v4576_v62 }
 0x1ec   : > { %v3180_v19 = vpack.c.bf16 %v2612_v34, %v2612_v34  ;;  %v2468_v9 = vcombine.high %v2460_v39, %v2460_v39  ;;  %v3125_v60 = vrot.slane %v2460_v39, 9  ;;  %v2816_v50 = vsel %vm2797_vm8, %v2815_v45, %v2814_v16 }
 0x1ed   : > { %v3181_v20 = vpack.c.bf16 %v2613_v44, %v2613_v44  ;;  %v2770_v33 = vunpack.c.l.b16 %v3178_v43  ;;  %v2771_v28 = vunpack.c.l.b16 %v3179_v25  ;;  %v2469_v15 = vcombine.high %v2467_v54, %v2467_v54 }
 0x1ee   : > { %v2772_v51 = vunpack.c.l.b16 %v3180_v19  ;;  %v3126_v0 = vrot.slane %v2468_v9, 9  ;;  %v3127_v6 = vrot.slane %v2467_v54, 9  ;;  %v2842_v27 = vsel %vm2794_vm7, %v2841_v17, %v2840_v10 }
 0x1ef   : > { %v2773_v7 = vunpack.c.l.b16 %v3181_v20  ;;  %v2817_v53 = vrot.slane %v2770_v33, 4  ;;  %v2626_v29 = vmax.f32 %v2460_v39, %v3125_v60  ;;  %v2819_v2 = vrot.slane %v2771_v28, 3 }
 0x1f0   : > { %v3128_v3 = vrot.slane %v2469_v15, 9  ;;  %v2627_v57 = vmax.f32 %v2468_v9, %v3126_v0  ;;  %v2628_v62 = vmax.f32 %v2467_v54, %v3127_v6  ;;  %v2821_v59 = vrot.slane %v2772_v51, 2 }
 0x1f1   : > { %v2818_v4 = vsel %vm2800_vm9, %v2817_v53, %v2816_v50  ;;  %v2823_v8 = vrot.slane %v2773_v7, 1  ;;  %v3194_v30 = vpack.c.bf16 %v2626_v29, %v2626_v29  ;;  %v2844_v37 = vsel %vm2797_vm8, %v2843_v56, %v2842_v27 }
 0x1f2   : > { %v2820_v58 = vsel %vm2803_vm10, %v2819_v2, %v2818_v4  ;;  %v2629_v22 = vmax.f32 %v2469_v15, %v3128_v3  ;;  %v3195_v5 = vpack.c.bf16 %v2627_v57, %v2627_v57  ;;  %v3196_v47 = vpack.c.bf16 %v2628_v62, %v2628_v62 }
 0x1f3   : > { %v2822_v21 = vsel %vm2806_vm11, %v2821_v59, %v2820_v58  ;;  %v2786_v23 = vunpack.c.l.b16 %v3194_v30 }
 0x1f4   : > { %v2824_v40 = vsel %vm2809_vm12, %v2823_v8, %v2822_v21  ;;  %v3197_v63 = vpack.c.bf16 %v2629_v22, %v2629_v22  ;;  %v2787_v42 = vunpack.c.l.b16 %v3195_v5  ;;  %v2788_v32 = vunpack.c.l.b16 %v3196_v47 }
 0x1f5   : > { %v2854_v12 = vpack.c.b16 %v2824_v40, %v2824_v40  ;;  %v2845_v41 = vrot.slane %v2786_v23, 4 }
 0x1f6   : > { %v2789_v14 = vunpack.c.l.b16 %v3197_v63  ;;  %v2847_v31 = vrot.slane %v2787_v42, 3  ;;  %v2849_v26 = vrot.slane %v2788_v32, 2 }
 0x1f7   : > { %v2846_v48 = vsel %vm2800_vm9, %v2845_v41, %v2844_v37  ;;  %2862 = vst [vmem:[%s4656_s8 + $0x4] sm:$0xf] %v2854_v12 }
 0x1f8   : > { %v2848_v11 = vsel %vm2803_vm10, %v2847_v31, %v2846_v48  ;;  %v2851_v61 = vrot.slane %v2789_v14, 1 }
 0x1f9   : > { %v2850_v49 = vsel %vm2806_vm11, %v2849_v26, %v2848_v11 }
 0x1fa   : > { %v2852_v36 = vsel %vm2809_vm12, %v2851_v61, %v2850_v49 }
 0x1fb   : > { %v2856_v46 = vpack.c.b16 %v2852_v36, %v2852_v36 }
 0x1fd   : > { %2864 = vst [vmem:[%s4656_s8 + $0xc] sm:$0xf] %v2856_v46 }
 0x1fe   : > { %3970 = shalt.err (!%p3967_p6)
}
 0x1ff   : > { %s3971_s28 = scalar_lea.hbm %s4698_s19, 256  ;;  %s3975_s4 = scalar_lea.hbm %s4754_s3, 512 }
 0x200   : > { %p3972_p7 = scmp.ne.s32.totalorder %s4698_s19, %s3971_s28  ;;  %p3976_p0 = scmp.lt.u32.totalorder %s4698_s19, %s4754_s3 }
 0x201   : > { %p3977_p2 = scmp.lt.u32.totalorder %s3975_s4, %s3971_s28  ;;  %p3979_p8 = scmp.lt.u32.totalorder %s3971_s28, %s4698_s19 }
 0x202   : > { %p3973_p9 = pnand %p3972_p7, %p4770_p10 }
 0x203   : > { %p3978_p4 = por %p3977_p2, %p3976_p0 }
 0x204   : > { %p3974_p12 = pneg %p3973_p9 }
 0x205   : > { %p3980_p11 = por %p3979_p8, %p3978_p4 }
 0x207   : > { %p3981_p13 = pnand %p3980_p11, %p3974_p12 }
 0x209   : > { %3984 = shalt.err (!%p3981_p13)
}
 0x20a   : > { %s4046_s7 = smov 64   ;;  %s4047_s8 = smov 4  }
 0x20b   : > { %3780 = dma.vmem_to_hbm [thread:$0]  (%p4770_p10), %s4700_s10, 256, %s4698_s19, %s4705_s15, %s4046_s7, %s4046_s7, %s4047_s8  }
 0x20c PF: > { %p3792_p1 = scmp.ge.s32.totalorder %s4039_s17, 2  ;;  %s2896_s9 = sand.u32 1, %s4019_s12  }
 0x20d   : > { %p4771_p3 = scmp.ne.s32.totalorder %s4760_s24, 0  ;;  %s2897_s11 = scalar_lea.sflag [#allocation4], %s2896_s9 }
 0x20f   : > { %p3787_p5 = pnand %p3792_p1, %p4771_p3 }
 0x211   : > { %4014 = dma.done.wait (!%p3787_p5), %s2897_s11, 256  }
 0x212   : > { %4016 = vsyncadd (!%p3787_p5), %s2897_s11, 4294967040  ;;  %s17_s17 = sadd.s32 1, %s4039_s17   ;;  %s4772_s12 = smov %s4023_s13 }
 0x213   : > { %p14_p6 = scmp.ge.s32.totalorder %s17_s17, 4   ;;  %s4773_s13 = smov %s4027_s14 }
 0x214   : > { %s4774_s14 = smov %s4121_s25  ;;  %s4775_s15 = smov %s4035_s16 }
 0x215   : > { %s4776_s16 = smov %s4778_s20  ;;  %16 = sbr.rel (!%p14_p6) target bundleno = 5 (0x5), region = 80 }
 0x21c   :  { %2902 = vsyncpa [#allocation3], 1 }
 0x21d   :  { %2904 = vsyncpa [#allocation3 + $0x1], 1 }
 0x21e   :  { %2905 = vsyncpa [#allocation4], 1 }
 0x21f   :  { %2907 = vsyncpa [#allocation4 + $0x1], 1 }

</bundles_post_ra>
